<compile_context>
chip_gen: v5e
topology: v5e:2x2
jax: 0.10.0
libtpu: 0.0.40
codegen_flags: <defaults>
</compile_context>

<pallas_src>
import functools

import jax
import jax.numpy as jnp
from jax.experimental import pallas as pl
from jax.experimental.pallas import tpu as pltpu


_VMEM_LIMIT = 48 * 1024 * 1024     # fits v5e/v6e (128 MiB) and v7x (64 MiB)
_TILE_BUDGET = 20 * 1024 * 1024    # working-set budget for pipelined blocks


def _round_up(x, m):
    return ((x + m - 1) // m) * m


def _pick_row_tiling(n_rows, bytes_per_row, tm_cap=2048):
    """Row-tile size that fits the (double-buffered) VMEM budget, is a multiple
    of 8, and keeps pad rows <= 7 per tile (avoids big pad/slice round trips)."""
    tm_max = max(8, min(tm_cap, _TILE_BUDGET // max(bytes_per_row, 1)))
    tm_max = max(8, (tm_max // 8) * 8)
    n_tiles = -(-n_rows // tm_max)
    tm = _round_up(-(-n_rows // n_tiles), 8)
    return tm, n_tiles * tm


# ---------------------------------------------------------------------------
# Kernel 1: base embeddings + fused GRU input projection (row-tiled, parallel)
#   base = x @ W_trx + b_trx                      (N, E)
#   gi   = x @ W_comb + b_comb                    (N, 3H)   lane-dense store
# where W_comb = W_trx @ W_ih (folded), b_comb = b_trx @ W_ih + b_ih.
# ---------------------------------------------------------------------------
def _encode_kernel(x_ref, wt_ref, bt_ref, wc_ref, bc_ref, base_ref, gi_ref):
    x = x_ref[...].astype(wt_ref.dtype)            # bf16 MXU operands
    base = jnp.dot(x, wt_ref[...], preferred_element_type=jnp.float32) + bt_ref[...]
    base_ref[...] = base.astype(base_ref.dtype)
    gi = jnp.dot(x, wc_ref[...], preferred_element_type=jnp.float32) + bc_ref[...]
    gi_ref[...] = gi.astype(gi_ref.dtype)


def encode_pallas(x2d, w_trx, b_trx, w_comb, b_comb):
    """x2d: (N, F). Returns base2d (N, E) in x dtype and gi (N, 3H) in bf16."""
    N, F = x2d.shape
    E = w_trx.shape[1]
    H3 = w_comb.shape[1]
    bytes_per_row = 2 * (F * x2d.dtype.itemsize + E * x2d.dtype.itemsize + H3 * 2)
    tm, Np = _pick_row_tiling(N, bytes_per_row)
    if Np != N:
        x2d = jnp.pad(x2d, ((0, Np - N), (0, 0)))

    base, gi = pl.pallas_call(
        _encode_kernel,
        out_shape=(jax.ShapeDtypeStruct((Np, E), x2d.dtype),
                   jax.ShapeDtypeStruct((Np, H3), jnp.bfloat16)),
        grid=(Np // tm,),
        in_specs=[
            pl.BlockSpec((tm, F), lambda i: (i, 0)),
            pl.BlockSpec((F, E), lambda i: (0, 0)),
            pl.BlockSpec((1, E), lambda i: (0, 0)),
            pl.BlockSpec((F, H3), lambda i: (0, 0)),
            pl.BlockSpec((1, H3), lambda i: (0, 0)),
        ],
        out_specs=(pl.BlockSpec((tm, E), lambda i: (i, 0)),
                   pl.BlockSpec((tm, H3), lambda i: (i, 0))),
        compiler_params=pltpu.CompilerParams(
            dimension_semantics=("parallel",),
            vmem_limit_bytes=_VMEM_LIMIT),
    )(x2d, w_trx, b_trx, w_comb, b_comb)

    if Np != N:
        base = base[:N]
        gi = gi[:N]
    return base, gi


# ---------------------------------------------------------------------------
# Kernel 2: GRU recurrence over precomputed input gates.
# Grid = (batch_tiles [parallel], time_chunks [arbitrary, serial]); the time
# axis is innermost so the VMEM hidden-state scratch is re-initialized at
# t == 0 for each batch tile. One fused (bb,H)x(H,3H) matmul per timestep.
# Matches torch.nn.GRU cell equations (gate order r, z, n).
# ---------------------------------------------------------------------------
def _gru_kernel(gi_ref, wh_ref, bh_ref, o_ref, h_ref, *, tb, hidden):
    t = pl.program_id(1)

    @pl.when(t == 0)
    def _():
        h_ref[...] = jnp.zeros_like(h_ref)

    H = hidden
    h = h_ref[...]                                   # (bb, H) f32
    wh = wh_ref[...]                                 # (H, 3H) bf16, hoisted
    bh = bh_ref[...]                                 # (1, 3H) f32, hoisted

    for tt in range(tb):                             # static unroll (tb vreg-bounded)
        gi = gi_ref[:, tt, :].astype(jnp.float32)    # (bb, 3H)
        gh = jnp.dot(h.astype(wh.dtype), wh,
                     preferred_element_type=jnp.float32) + bh
        r = jax.nn.sigmoid(gi[:, :H] + gh[:, :H])
        z = jax.nn.sigmoid(gi[:, H:2 * H] + gh[:, H:2 * H])
        n = jnp.tanh(gi[:, 2 * H:] + r * gh[:, 2 * H:])
        h = (1.0 - z) * n + z * h
        o_ref[:, tt, :] = h.astype(o_ref.dtype)

    h_ref[...] = h


def gru_pallas(gi, w_hh, b_hh, out_dtype):
    """gi: (B, T, 3H) bf16 precomputed input gates; w_hh: (H, 3H); b_hh: (1, 3H).

    Returns context embeddings (B, T, H) in batch-major layout.
    """
    B, T, H3 = gi.shape
    H = H3 // 3
    out_bytes = jnp.dtype(out_dtype).itemsize

    # Batch tiling: split across TensorCores (v7x megacore) when each tile
    # keeps >= 8 sublane rows; otherwise a single tile (no-op on v5e/v6e).
    nb = 2 if (B % 2 == 0 and (B // 2) % 8 == 0) else 1
    bb = B // nb

    # Time-chunk size: VMEM budget (double-buffered gi + out blocks) and a
    # vreg-pressure cap so the static unroll does not spill at large H.
    per_t = 2 * (bb * H3 * 2) + 2 * (bb * H * out_bytes)
    tb = max(8, (_TILE_BUDGET // max(per_t, 1)) // 8 * 8)
    tb = min(tb, max(8, (32 // -(-H // 128)) // 8 * 8))   # H<=128 -> 32 ... H>=512 -> 8
    tb = min(tb, _round_up(T, 8))
    Tp = _round_up(T, tb)
    if Tp != T:
        gi = jnp.pad(gi, ((0, 0), (0, Tp - T), (0, 0)))

    cost = pl.CostEstimate(
        flops=int(2 * B * Tp * H * H3 + 12 * B * Tp * H),
        transcendentals=int(3 * B * Tp * H),
        bytes_accessed=int(2 * B * Tp * H3 + out_bytes * B * Tp * H + 2 * H * H3),
    )

    ctx = pl.pallas_call(
        functools.partial(_gru_kernel, tb=tb, hidden=H),
        out_shape=jax.ShapeDtypeStruct((B, Tp, H), out_dtype),
        grid=(nb, Tp // tb),
        in_specs=[
            pl.BlockSpec((bb, tb, H3), lambda b, t: (b, t, 0)),
            pl.BlockSpec((H, H3), lambda b, t: (0, 0)),
            pl.BlockSpec((1, H3), lambda b, t: (0, 0)),
        ],
        out_specs=pl.BlockSpec((bb, tb, H), lambda b, t: (b, t, 0)),
        scratch_shapes=[pltpu.VMEM((bb, H), jnp.float32)],
        compiler_params=pltpu.CompilerParams(
            dimension_semantics=("parallel", "arbitrary"),  # serial recurrence in t
            vmem_limit_bytes=_VMEM_LIMIT),
        cost_estimate=cost,
    )(gi, w_hh, b_hh)

    if Tp != T:
        ctx = ctx[:, :T]
    return ctx


# ---------------------------------------------------------------------------
# Kernel 3: all K CPC heads fused into one (H, K*L) matmul (lane-dense output),
# row-tiled and megacore-parallel. Columns are pre-permuted (col = l*K + k) so
# the result reshapes straight to (B, T, L, K) -- no trailing transpose.
# ---------------------------------------------------------------------------
def _heads_kernel(ctx_ref, w_ref, b_ref, o_ref):
    o_ref[...] = (
        jnp.dot(ctx_ref[...].astype(w_ref.dtype), w_ref[...],
                preferred_element_type=jnp.float32)
        + b_ref[...]
    ).astype(o_ref.dtype)


def heads_pallas(ctx2d, w_cat, b_cat):
    """ctx2d: (N, H); w_cat: (H, K*L) bf16; b_cat: (1, K*L) -> (N, K*L)."""
    N, H = ctx2d.shape
    KL = w_cat.shape[1]
    bytes_per_row = 2 * (H * ctx2d.dtype.itemsize + KL * ctx2d.dtype.itemsize)
    tm, Np = _pick_row_tiling(N, bytes_per_row)
    if Np != N:
        ctx2d = jnp.pad(ctx2d, ((0, Np - N), (0, 0)))

    out = pl.pallas_call(
        _heads_kernel,
        out_shape=jax.ShapeDtypeStruct((Np, KL), ctx2d.dtype),
        grid=(Np // tm,),
        in_specs=[
            pl.BlockSpec((tm, H), lambda i: (i, 0)),
            pl.BlockSpec((H, KL), lambda i: (0, 0)),
            pl.BlockSpec((1, KL), lambda i: (0, 0)),
        ],
        out_specs=pl.BlockSpec((tm, KL), lambda i: (i, 0)),
        compiler_params=pltpu.CompilerParams(
            dimension_semantics=("parallel",),
            vmem_limit_bytes=_VMEM_LIMIT),
    )(ctx2d, w_cat, b_cat)

    if Np != N:
        out = out[:N]
    return out


# ---------------------------------------------------------------------------
# Parameter construction (deterministic, PyTorch-default-style uniform init)
# ---------------------------------------------------------------------------
def _uniform(key, shape, fan_in):
    bound = 1.0 / jnp.sqrt(jnp.float32(fan_in))
    return jax.random.uniform(key, shape, jnp.float32, -bound, bound)


def init_params(key, F, E, H, L, K):
    ks = jax.random.split(key, 8)
    return {
        # trx_encoder Linear(F -> E): torch W is (E, F); stored transposed (F, E)
        "trx_w": _uniform(ks[0], (F, E), F),
        "trx_b": _uniform(ks[1], (1, E), F),
        # GRU(E -> H): torch weight_ih (3H, E) / weight_hh (3H, H), gate order
        # (r, z, n); stored transposed and gate-concatenated along lanes (·, 3H).
        "gru_wi": _uniform(ks[2], (E, 3 * H), H),
        "gru_wh": _uniform(ks[3], (H, 3 * H), H),
        "gru_bi": _uniform(ks[4], (1, 3 * H), H),
        "gru_bh": _uniform(ks[5], (1, 3 * H), H),
        # K heads Linear(H -> L), columns pre-permuted with col = l*K + k so the
        # fused output is already in torch stack(dim=3) order.  A torch
        # checkpoint would be loaded as stack([W_k.T for k], -1).reshape(H, L*K).
        "head_w": _uniform(ks[6], (H, L * K), H),
        "head_b": _uniform(ks[7], (1, L * K), H),
    }


# ---------------------------------------------------------------------------
# CPC_Ecoder.forward equivalent
# ---------------------------------------------------------------------------
def cpc_encoder_forward(params, x, seq_lens, *, n_forward_steps):
    """x: (B, T, F) padded batch payload; seq_lens: (B,) int32.

    Returns (base_embeddings, context_embeddings, mapped_ctx_embeddings),
    each "PaddedBatch" represented as a (payload, seq_lens) tuple.
    """
    B, T, F = x.shape
    E = params["trx_w"].shape[1]
    H = params["gru_wh"].shape[0]
    K = n_forward_steps
    L = params["head_w"].shape[1] // K

    # Fold the trx Linear into the GRU input projection (tiny weight-only op):
    #   gi = (x@W_trx + b_trx)@W_ih + b_ih = x@(W_trx@W_ih) + (b_trx@W_ih + b_ih)
    w_comb = jnp.dot(params["trx_w"], params["gru_wi"])
    b_comb = jnp.dot(params["trx_b"], params["gru_wi"]) + params["gru_bi"]

    # bf16 MXU operands (accumulation, biases, gate math stay in f32).
    trx_w = params["trx_w"].astype(jnp.bfloat16)
    w_comb = w_comb.astype(jnp.bfloat16)
    gru_wh = params["gru_wh"].astype(jnp.bfloat16)
    head_w = params["head_w"].astype(jnp.bfloat16)

    # Kernel 1: trx_encoder + all-timestep GRU input gates (fused, parallel)
    base2d, gi2d = encode_pallas(
        x.reshape(B * T, F), trx_w, params["trx_b"], w_comb, b_comb)
    base = base2d.reshape(B, T, E)
    gi = gi2d.reshape(B, T, 3 * H)

    # Kernel 2: seq_encoder (GRU recurrence only) -> batch-major (B, T, H)
    ctx = gru_pallas(gi, gru_wh, params["gru_bh"], x.dtype)

    # Kernel 3: n_forward_steps heads fused into one matmul; pre-permuted
    # columns make the reshape the final (B, T, L, K) layout (stack dim=3).
    mapped2d = heads_pallas(ctx.reshape(B * T, H), head_w, params["head_b"])
    mapped = mapped2d.reshape(B, T, L, K)

    return (base, seq_lens), (ctx, seq_lens), (mapped, seq_lens)


if __name__ == "__main__":
    B, T, F = 2, 8, 8          # batch, seq len, raw trx features
    E, H = 16, 32              # trx embedding size, seq_encoder hidden_size
    L, K = 16, 3               # linear_size, n_forward_steps

    key = jax.random.PRNGKey(0)
    k_param, k_x = jax.random.split(key)

    params = init_params(k_param, F, E, H, L, K)
    x = jax.random.normal(k_x, (B, T, F), jnp.float32)
    seq_lens = jnp.full((B,), T, jnp.int32)

    fwd = jax.jit(functools.partial(cpc_encoder_forward, n_forward_steps=K))
    (base, _), (ctx, _), (mapped, _) = fwd(params, x, seq_lens)
    jax.block_until_ready((base, ctx, mapped))

    assert base.shape == (B, T, E)
    assert ctx.shape == (B, T, H)
    assert mapped.shape == (B, T, L, K)
    print("KERNEL_OK")
</pallas_src>

<mosaic_0001>
module attributes {stable_mosaic.version = 11 : i64} {
  func.func @_encode_kernel(%arg0: i32, %arg1: memref<16x8xf32, #tpu.memory_space<vmem>>, %arg2: memref<8x16xbf16, #tpu.memory_space<vmem>>, %arg3: memref<1x16xf32, #tpu.memory_space<vmem>>, %arg4: memref<8x96xbf16, #tpu.memory_space<vmem>>, %arg5: memref<1x96xf32, #tpu.memory_space<vmem>>, %arg6: memref<16x16xf32, #tpu.memory_space<vmem>>, %arg7: memref<16x96xbf16, #tpu.memory_space<vmem>>) attributes {dimension_semantics = [#tpu.dimension_semantics<parallel>], iteration_bounds = array<i64: 1>, scalar_prefetch = 0 : i64, scratch_operands = 0 : i64, tpu.core_type = #tpu.core_type<tc>, window_params = [{transform_indices = @transform_0, window_bounds = array<i64: 16, 8>}, {pipeline_mode = #tpu.pipeline_mode<synchronous>, transform_indices = @transform_1, window_bounds = array<i64: 8, 16>}, {pipeline_mode = #tpu.pipeline_mode<synchronous>, transform_indices = @transform_2, window_bounds = array<i64: 1, 16>}, {pipeline_mode = #tpu.pipeline_mode<synchronous>, transform_indices = @transform_3, window_bounds = array<i64: 8, 96>}, {pipeline_mode = #tpu.pipeline_mode<synchronous>, transform_indices = @transform_4, window_bounds = array<i64: 1, 96>}, {transform_indices = @transform_5, window_bounds = array<i64: 16, 16>}, {transform_indices = @transform_6, window_bounds = array<i64: 16, 96>}]} {
    %c0 = arith.constant 0 : index
    %c0_0 = arith.constant 0 : index
    %0 = vector.load %arg1[%c0, %c0_0] : memref<16x8xf32, #tpu.memory_space<vmem>>, vector<16x8xf32>
    %1 = arith.truncf %0 : vector<16x8xf32> to vector<16x8xbf16>
    %c0_1 = arith.constant 0 : index
    %c0_2 = arith.constant 0 : index
    %2 = vector.load %arg2[%c0_1, %c0_2] : memref<8x16xbf16, #tpu.memory_space<vmem>>, vector<8x16xbf16>
    %cst = arith.constant dense<0.000000e+00> : vector<16x16xf32>
    %3 = tpu.matmul %1, %2, %cst {dimension_numbers = #tpu.dot_dimension_numbers<[1], [0], [0], [1], [0, 0, 1, 1], [], []>} : vector<16x8xbf16>, vector<8x16xbf16>, vector<16x16xf32> -> vector<16x16xf32>
    %c0_3 = arith.constant 0 : index
    %c0_4 = arith.constant 0 : index
    %4 = vector.load %arg3[%c0_3, %c0_4] : memref<1x16xf32, #tpu.memory_space<vmem>>, vector<1x16xf32>
    %5 = vector.broadcast %4 : vector<1x16xf32> to vector<16x16xf32>
    %6 = arith.addf %3, %5 : vector<16x16xf32>
    %c0_5 = arith.constant 0 : index
    %c0_6 = arith.constant 0 : index
    %7 = vector.load %arg6[%c0_5, %c0_6] : memref<16x16xf32, #tpu.memory_space<vmem>>, vector<16x16xf32>
    tpu.vector_store %arg6[%c0_5, %c0_6], %6 {strides = array<i32>} : memref<16x16xf32, #tpu.memory_space<vmem>>, vector<16x16xf32>,
    %c0_7 = arith.constant 0 : index
    %c0_8 = arith.constant 0 : index
    %8 = vector.load %arg4[%c0_7, %c0_8] : memref<8x96xbf16, #tpu.memory_space<vmem>>, vector<8x96xbf16>
    %cst_9 = arith.constant dense<0.000000e+00> : vector<16x96xf32>
    %9 = tpu.matmul %1, %8, %cst_9 {dimension_numbers = #tpu.dot_dimension_numbers<[1], [0], [0], [1], [0, 0, 1, 1], [], []>} : vector<16x8xbf16>, vector<8x96xbf16>, vector<16x96xf32> -> vector<16x96xf32>
    %c0_10 = arith.constant 0 : index
    %c0_11 = arith.constant 0 : index
    %10 = vector.load %arg5[%c0_10, %c0_11] : memref<1x96xf32, #tpu.memory_space<vmem>>, vector<1x96xf32>
    %11 = vector.broadcast %10 : vector<1x96xf32> to vector<16x96xf32>
    %12 = arith.addf %9, %11 : vector<16x96xf32>
    %13 = arith.truncf %12 : vector<16x96xf32> to vector<16x96xbf16>
    %c0_12 = arith.constant 0 : index
    %c0_13 = arith.constant 0 : index
    %14 = vector.load %arg7[%c0_12, %c0_13] : memref<16x96xbf16, #tpu.memory_space<vmem>>, vector<16x96xbf16>
    tpu.vector_store %arg7[%c0_12, %c0_13], %13 {strides = array<i32>} : memref<16x96xbf16, #tpu.memory_space<vmem>>, vector<16x96xbf16>,
    return
  }
  func.func @transform_0(%arg0: i32) -> (i32, i32) {
    %c0_i32 = arith.constant 0 : i32
    %c0_i32_0 = arith.constant 0 : i32
    return %arg0, %c0_i32 : i32, i32
  }
  func.func @transform_1(%arg0: i32) -> (i32, i32) {
    %c0_i32 = arith.constant 0 : i32
    %c0_i32_0 = arith.constant 0 : i32
    %c0_i32_1 = arith.constant 0 : i32
    return %c0_i32, %c0_i32_0 : i32, i32
  }
  func.func @transform_2(%arg0: i32) -> (i32, i32) {
    %c0_i32 = arith.constant 0 : i32
    %c0_i32_0 = arith.constant 0 : i32
    %c0_i32_1 = arith.constant 0 : i32
    return %c0_i32, %c0_i32_0 : i32, i32
  }
  func.func @transform_3(%arg0: i32) -> (i32, i32) {
    %c0_i32 = arith.constant 0 : i32
    %c0_i32_0 = arith.constant 0 : i32
    %c0_i32_1 = arith.constant 0 : i32
    return %c0_i32, %c0_i32_0 : i32, i32
  }
  func.func @transform_4(%arg0: i32) -> (i32, i32) {
    %c0_i32 = arith.constant 0 : i32
    %c0_i32_0 = arith.constant 0 : i32
    %c0_i32_1 = arith.constant 0 : i32
    return %c0_i32, %c0_i32_0 : i32, i32
  }
  func.func @transform_5(%arg0: i32) -> (i32, i32) {
    %c0_i32 = arith.constant 0 : i32
    %c0_i32_0 = arith.constant 0 : i32
    return %arg0, %c0_i32 : i32, i32
  }
  func.func @transform_6(%arg0: i32) -> (i32, i32) {
    %c0_i32 = arith.constant 0 : i32
    %c0_i32_0 = arith.constant 0 : i32
    return %arg0, %c0_i32 : i32, i32
  }
}

module attributes {stable_mosaic.version = 11 : i64} {
  func.func @_heads_kernel(%arg0: i32, %arg1: memref<16x32xf32, #tpu.memory_space<vmem>>, %arg2: memref<32x48xbf16, #tpu.memory_space<vmem>>, %arg3: memref<1x48xf32, #tpu.memory_space<vmem>>, %arg4: memref<16x48xf32, #tpu.memory_space<vmem>>) attributes {dimension_semantics = [#tpu.dimension_semantics<parallel>], iteration_bounds = array<i64: 1>, scalar_prefetch = 0 : i64, scratch_operands = 0 : i64, tpu.core_type = #tpu.core_type<tc>, window_params = [{transform_indices = @transform_0, window_bounds = array<i64: 16, 32>}, {pipeline_mode = #tpu.pipeline_mode<synchronous>, transform_indices = @transform_1, window_bounds = array<i64: 32, 48>}, {pipeline_mode = #tpu.pipeline_mode<synchronous>, transform_indices = @transform_2, window_bounds = array<i64: 1, 48>}, {transform_indices = @transform_3, window_bounds = array<i64: 16, 48>}]} {
    %c0 = arith.constant 0 : index
    %c0_0 = arith.constant 0 : index
    %0 = vector.load %arg1[%c0, %c0_0] : memref<16x32xf32, #tpu.memory_space<vmem>>, vector<16x32xf32>
    %1 = arith.truncf %0 : vector<16x32xf32> to vector<16x32xbf16>
    %c0_1 = arith.constant 0 : index
    %c0_2 = arith.constant 0 : index
    %2 = vector.load %arg2[%c0_1, %c0_2] : memref<32x48xbf16, #tpu.memory_space<vmem>>, vector<32x48xbf16>
    %cst = arith.constant dense<0.000000e+00> : vector<16x48xf32>
    %3 = tpu.matmul %1, %2, %cst {dimension_numbers = #tpu.dot_dimension_numbers<[1], [0], [0], [1], [0, 0, 1, 1], [], []>} : vector<16x32xbf16>, vector<32x48xbf16>, vector<16x48xf32> -> vector<16x48xf32>
    %c0_3 = arith.constant 0 : index
    %c0_4 = arith.constant 0 : index
    %4 = vector.load %arg3[%c0_3, %c0_4] : memref<1x48xf32, #tpu.memory_space<vmem>>, vector<1x48xf32>
    %5 = vector.broadcast %4 : vector<1x48xf32> to vector<16x48xf32>
    %6 = arith.addf %3, %5 : vector<16x48xf32>
    %c0_5 = arith.constant 0 : index
    %c0_6 = arith.constant 0 : index
    %7 = vector.load %arg4[%c0_5, %c0_6] : memref<16x48xf32, #tpu.memory_space<vmem>>, vector<16x48xf32>
    tpu.vector_store %arg4[%c0_5, %c0_6], %6 {strides = array<i32>} : memref<16x48xf32, #tpu.memory_space<vmem>>, vector<16x48xf32>,
    return
  }
  func.func @transform_0(%arg0: i32) -> (i32, i32) {
    %c0_i32 = arith.constant 0 : i32
    %c0_i32_0 = arith.constant 0 : i32
    return %arg0, %c0_i32 : i32, i32
  }
  func.func @transform_1(%arg0: i32) -> (i32, i32) {
    %c0_i32 = arith.constant 0 : i32
    %c0_i32_0 = arith.constant 0 : i32
    %c0_i32_1 = arith.constant 0 : i32
    return %c0_i32, %c0_i32_0 : i32, i32
  }
  func.func @transform_2(%arg0: i32) -> (i32, i32) {
    %c0_i32 = arith.constant 0 : i32
    %c0_i32_0 = arith.constant 0 : i32
    %c0_i32_1 = arith.constant 0 : i32
    return %c0_i32, %c0_i32_0 : i32, i32
  }
  func.func @transform_3(%arg0: i32) -> (i32, i32) {
    %c0_i32 = arith.constant 0 : i32
    %c0_i32_0 = arith.constant 0 : i32
    return %arg0, %c0_i32 : i32, i32
  }
}

module attributes {stable_mosaic.version = 11 : i64} {
  func.func @_gru_kernel(%arg0: i32, %arg1: i32, %arg2: memref<2x8x96xbf16, #tpu.memory_space<vmem>>, %arg3: memref<32x96xbf16, #tpu.memory_space<vmem>>, %arg4: memref<1x96xf32, #tpu.memory_space<vmem>>, %arg5: memref<2x8x32xf32, #tpu.memory_space<vmem>>, %arg6: memref<2x32xf32, #tpu.memory_space<vmem>>) attributes {dimension_semantics = [#tpu.dimension_semantics<parallel>, #tpu.dimension_semantics<arbitrary>], iteration_bounds = array<i64: 1, 1>, scalar_prefetch = 0 : i64, scratch_operands = 1 : i64, tpu.core_type = #tpu.core_type<tc>, window_params = [{transform_indices = @transform_0, window_bounds = array<i64: 2, 8, 96>}, {pipeline_mode = #tpu.pipeline_mode<synchronous>, transform_indices = @transform_1, window_bounds = array<i64: 32, 96>}, {pipeline_mode = #tpu.pipeline_mode<synchronous>, transform_indices = @transform_2, window_bounds = array<i64: 1, 96>}, {transform_indices = @transform_3, window_bounds = array<i64: 2, 8, 32>}]} {
    %c0_i32 = arith.constant 0 : i32
    %0 = arith.cmpi eq, %arg1, %c0_i32 : i32
    %1 = arith.extui %0 : i1 to i32
    %c0_i32_0 = arith.constant 0 : i32
    %2 = arith.cmpi ne, %1, %c0_i32_0 : i32
    scf.if %2 {
      %cst_80 = arith.constant 0.000000e+00 : f32
      %295 = vector.broadcast %cst_80 : f32 to vector<2x32xf32>
      %c0_81 = arith.constant 0 : index
      %c0_82 = arith.constant 0 : index
      %296 = vector.load %arg6[%c0_81, %c0_82] : memref<2x32xf32, #tpu.memory_space<vmem>>, vector<2x32xf32>
      tpu.vector_store %arg6[%c0_81, %c0_82], %295 {strides = array<i32>} : memref<2x32xf32, #tpu.memory_space<vmem>>, vector<2x32xf32>,
    } else {
    }
    %c0 = arith.constant 0 : index
    %c0_1 = arith.constant 0 : index
    %3 = vector.load %arg6[%c0, %c0_1] : memref<2x32xf32, #tpu.memory_space<vmem>>, vector<2x32xf32>
    %c0_2 = arith.constant 0 : index
    %c0_3 = arith.constant 0 : index
    %4 = vector.load %arg3[%c0_2, %c0_3] : memref<32x96xbf16, #tpu.memory_space<vmem>>, vector<32x96xbf16>
    %c0_4 = arith.constant 0 : index
    %c0_5 = arith.constant 0 : index
    %5 = vector.load %arg4[%c0_4, %c0_5] : memref<1x96xf32, #tpu.memory_space<vmem>>, vector<1x96xf32>
    %c0_6 = arith.constant 0 : index
    %c0_7 = arith.constant 0 : index
    %c0_8 = arith.constant 0 : index
    %6 = vector.load %arg2[%c0_6, %c0_7, %c0_8] : memref<2x8x96xbf16, #tpu.memory_space<vmem>>, vector<2x1x96xbf16>
    %7 = vector.shape_cast %6 : vector<2x1x96xbf16> to vector<2x96xbf16>
    %8 = arith.extf %7 : vector<2x96xbf16> to vector<2x96xf32>
    %9 = arith.truncf %3 : vector<2x32xf32> to vector<2x32xbf16>
    %cst = arith.constant dense<0.000000e+00> : vector<2x96xf32>
    %10 = tpu.matmul %9, %4, %cst {dimension_numbers = #tpu.dot_dimension_numbers<[1], [0], [0], [1], [0, 0, 1, 1], [], []>} : vector<2x32xbf16>, vector<32x96xbf16>, vector<2x96xf32> -> vector<2x96xf32>
    %11 = vector.broadcast %5 : vector<1x96xf32> to vector<2x96xf32>
    %12 = arith.addf %10, %11 : vector<2x96xf32>
    %13 = vector.extract_strided_slice %8 {offsets = [0, 0], sizes = [2, 32], strides = [1, 1]} : vector<2x96xf32> to vector<2x32xf32>
    %14 = vector.extract_strided_slice %12 {offsets = [0, 0], sizes = [2, 32], strides = [1, 1]} : vector<2x96xf32> to vector<2x32xf32>
    %15 = arith.addf %13, %14 : vector<2x32xf32>
    %16 = arith.negf %15 : vector<2x32xf32>
    %17 = math.exp %16 : vector<2x32xf32>
    %cst_9 = arith.constant 1.000000e+00 : f32
    %18 = vector.broadcast %cst_9 : f32 to vector<2x32xf32>
    %19 = arith.addf %18, %17 : vector<2x32xf32>
    %20 = arith.divf %18, %19 : vector<2x32xf32>
    %21 = vector.extract_strided_slice %8 {offsets = [0, 32], sizes = [2, 32], strides = [1, 1]} : vector<2x96xf32> to vector<2x32xf32>
    %22 = vector.extract_strided_slice %12 {offsets = [0, 32], sizes = [2, 32], strides = [1, 1]} : vector<2x96xf32> to vector<2x32xf32>
    %23 = arith.addf %21, %22 : vector<2x32xf32>
    %24 = arith.negf %23 : vector<2x32xf32>
    %25 = math.exp %24 : vector<2x32xf32>
    %cst_10 = arith.constant 1.000000e+00 : f32
    %26 = vector.broadcast %cst_10 : f32 to vector<2x32xf32>
    %27 = arith.addf %26, %25 : vector<2x32xf32>
    %28 = arith.divf %26, %27 : vector<2x32xf32>
    %29 = vector.extract_strided_slice %8 {offsets = [0, 64], sizes = [2, 32], strides = [1, 1]} : vector<2x96xf32> to vector<2x32xf32>
    %30 = vector.extract_strided_slice %12 {offsets = [0, 64], sizes = [2, 32], strides = [1, 1]} : vector<2x96xf32> to vector<2x32xf32>
    %31 = arith.mulf %20, %30 : vector<2x32xf32>
    %32 = arith.addf %29, %31 : vector<2x32xf32>
    %33 = math.tanh %32 : vector<2x32xf32>
    %cst_11 = arith.constant 1.000000e+00 : f32
    %34 = vector.broadcast %cst_11 : f32 to vector<2x32xf32>
    %35 = arith.subf %34, %28 : vector<2x32xf32>
    %36 = arith.mulf %35, %33 : vector<2x32xf32>
    %37 = arith.mulf %28, %3 : vector<2x32xf32>
    %38 = arith.addf %36, %37 : vector<2x32xf32>
    %c0_12 = arith.constant 0 : index
    %c0_13 = arith.constant 0 : index
    %c0_14 = arith.constant 0 : index
    %39 = vector.load %arg5[%c0_12, %c0_13, %c0_14] : memref<2x8x32xf32, #tpu.memory_space<vmem>>, vector<2x1x32xf32>
    %40 = vector.shape_cast %39 : vector<2x1x32xf32> to vector<2x32xf32>
    %41 = vector.shape_cast %38 : vector<2x32xf32> to vector<2x1x32xf32>
    tpu.vector_store %arg5[%c0_12, %c0_13, %c0_14], %41 {strides = array<i32>} : memref<2x8x32xf32, #tpu.memory_space<vmem>>, vector<2x1x32xf32>,
    %c0_15 = arith.constant 0 : index
    %c1 = arith.constant 1 : index
    %c0_16 = arith.constant 0 : index
    %42 = vector.load %arg2[%c0_15, %c1, %c0_16] : memref<2x8x96xbf16, #tpu.memory_space<vmem>>, vector<2x1x96xbf16>
    %43 = vector.shape_cast %42 : vector<2x1x96xbf16> to vector<2x96xbf16>
    %44 = arith.extf %43 : vector<2x96xbf16> to vector<2x96xf32>
    %45 = arith.truncf %38 : vector<2x32xf32> to vector<2x32xbf16>
    %cst_17 = arith.constant dense<0.000000e+00> : vector<2x96xf32>
    %46 = tpu.matmul %45, %4, %cst_17 {dimension_numbers = #tpu.dot_dimension_numbers<[1], [0], [0], [1], [0, 0, 1, 1], [], []>} : vector<2x32xbf16>, vector<32x96xbf16>, vector<2x96xf32> -> vector<2x96xf32>
    %47 = vector.broadcast %5 : vector<1x96xf32> to vector<2x96xf32>
    %48 = arith.addf %46, %47 : vector<2x96xf32>
    %49 = vector.extract_strided_slice %44 {offsets = [0, 0], sizes = [2, 32], strides = [1, 1]} : vector<2x96xf32> to vector<2x32xf32>
    %50 = vector.extract_strided_slice %48 {offsets = [0, 0], sizes = [2, 32], strides = [1, 1]} : vector<2x96xf32> to vector<2x32xf32>
    %51 = arith.addf %49, %50 : vector<2x32xf32>
    %52 = arith.negf %51 : vector<2x32xf32>
    %53 = math.exp %52 : vector<2x32xf32>
    %cst_18 = arith.constant 1.000000e+00 : f32
    %54 = vector.broadcast %cst_18 : f32 to vector<2x32xf32>
    %55 = arith.addf %54, %53 : vector<2x32xf32>
    %56 = arith.divf %54, %55 : vector<2x32xf32>
    %57 = vector.extract_strided_slice %44 {offsets = [0, 32], sizes = [2, 32], strides = [1, 1]} : vector<2x96xf32> to vector<2x32xf32>
    %58 = vector.extract_strided_slice %48 {offsets = [0, 32], sizes = [2, 32], strides = [1, 1]} : vector<2x96xf32> to vector<2x32xf32>
    %59 = arith.addf %57, %58 : vector<2x32xf32>
    %60 = arith.negf %59 : vector<2x32xf32>
    %61 = math.exp %60 : vector<2x32xf32>
    %cst_19 = arith.constant 1.000000e+00 : f32
    %62 = vector.broadcast %cst_19 : f32 to vector<2x32xf32>
    %63 = arith.addf %62, %61 : vector<2x32xf32>
    %64 = arith.divf %62, %63 : vector<2x32xf32>
    %65 = vector.extract_strided_slice %44 {offsets = [0, 64], sizes = [2, 32], strides = [1, 1]} : vector<2x96xf32> to vector<2x32xf32>
    %66 = vector.extract_strided_slice %48 {offsets = [0, 64], sizes = [2, 32], strides = [1, 1]} : vector<2x96xf32> to vector<2x32xf32>
    %67 = arith.mulf %56, %66 : vector<2x32xf32>
    %68 = arith.addf %65, %67 : vector<2x32xf32>
    %69 = math.tanh %68 : vector<2x32xf32>
    %cst_20 = arith.constant 1.000000e+00 : f32
    %70 = vector.broadcast %cst_20 : f32 to vector<2x32xf32>
    %71 = arith.subf %70, %64 : vector<2x32xf32>
    %72 = arith.mulf %71, %69 : vector<2x32xf32>
    %73 = arith.mulf %64, %38 : vector<2x32xf32>
    %74 = arith.addf %72, %73 : vector<2x32xf32>
    %c0_21 = arith.constant 0 : index
    %c1_22 = arith.constant 1 : index
    %c0_23 = arith.constant 0 : index
    %75 = vector.load %arg5[%c0_21, %c1_22, %c0_23] : memref<2x8x32xf32, #tpu.memory_space<vmem>>, vector<2x1x32xf32>
    %76 = vector.shape_cast %75 : vector<2x1x32xf32> to vector<2x32xf32>
    %77 = vector.shape_cast %74 : vector<2x32xf32> to vector<2x1x32xf32>
    tpu.vector_store %arg5[%c0_21, %c1_22, %c0_23], %77 {strides = array<i32>} : memref<2x8x32xf32, #tpu.memory_space<vmem>>, vector<2x1x32xf32>,
    %c0_24 = arith.constant 0 : index
    %c2 = arith.constant 2 : index
    %c0_25 = arith.constant 0 : index
    %78 = vector.load %arg2[%c0_24, %c2, %c0_25] : memref<2x8x96xbf16, #tpu.memory_space<vmem>>, vector<2x1x96xbf16>
    %79 = vector.shape_cast %78 : vector<2x1x96xbf16> to vector<2x96xbf16>
    %80 = arith.extf %79 : vector<2x96xbf16> to vector<2x96xf32>
    %81 = arith.truncf %74 : vector<2x32xf32> to vector<2x32xbf16>
    %cst_26 = arith.constant dense<0.000000e+00> : vector<2x96xf32>
    %82 = tpu.matmul %81, %4, %cst_26 {dimension_numbers = #tpu.dot_dimension_numbers<[1], [0], [0], [1], [0, 0, 1, 1], [], []>} : vector<2x32xbf16>, vector<32x96xbf16>, vector<2x96xf32> -> vector<2x96xf32>
    %83 = vector.broadcast %5 : vector<1x96xf32> to vector<2x96xf32>
    %84 = arith.addf %82, %83 : vector<2x96xf32>
    %85 = vector.extract_strided_slice %80 {offsets = [0, 0], sizes = [2, 32], strides = [1, 1]} : vector<2x96xf32> to vector<2x32xf32>
    %86 = vector.extract_strided_slice %84 {offsets = [0, 0], sizes = [2, 32], strides = [1, 1]} : vector<2x96xf32> to vector<2x32xf32>
    %87 = arith.addf %85, %86 : vector<2x32xf32>
    %88 = arith.negf %87 : vector<2x32xf32>
    %89 = math.exp %88 : vector<2x32xf32>
    %cst_27 = arith.constant 1.000000e+00 : f32
    %90 = vector.broadcast %cst_27 : f32 to vector<2x32xf32>
    %91 = arith.addf %90, %89 : vector<2x32xf32>
    %92 = arith.divf %90, %91 : vector<2x32xf32>
    %93 = vector.extract_strided_slice %80 {offsets = [0, 32], sizes = [2, 32], strides = [1, 1]} : vector<2x96xf32> to vector<2x32xf32>
    %94 = vector.extract_strided_slice %84 {offsets = [0, 32], sizes = [2, 32], strides = [1, 1]} : vector<2x96xf32> to vector<2x32xf32>
    %95 = arith.addf %93, %94 : vector<2x32xf32>
    %96 = arith.negf %95 : vector<2x32xf32>
    %97 = math.exp %96 : vector<2x32xf32>
    %cst_28 = arith.constant 1.000000e+00 : f32
    %98 = vector.broadcast %cst_28 : f32 to vector<2x32xf32>
    %99 = arith.addf %98, %97 : vector<2x32xf32>
    %100 = arith.divf %98, %99 : vector<2x32xf32>
    %101 = vector.extract_strided_slice %80 {offsets = [0, 64], sizes = [2, 32], strides = [1, 1]} : vector<2x96xf32> to vector<2x32xf32>
    %102 = vector.extract_strided_slice %84 {offsets = [0, 64], sizes = [2, 32], strides = [1, 1]} : vector<2x96xf32> to vector<2x32xf32>
    %103 = arith.mulf %92, %102 : vector<2x32xf32>
    %104 = arith.addf %101, %103 : vector<2x32xf32>
    %105 = math.tanh %104 : vector<2x32xf32>
    %cst_29 = arith.constant 1.000000e+00 : f32
    %106 = vector.broadcast %cst_29 : f32 to vector<2x32xf32>
    %107 = arith.subf %106, %100 : vector<2x32xf32>
    %108 = arith.mulf %107, %105 : vector<2x32xf32>
    %109 = arith.mulf %100, %74 : vector<2x32xf32>
    %110 = arith.addf %108, %109 : vector<2x32xf32>
    %c0_30 = arith.constant 0 : index
    %c2_31 = arith.constant 2 : index
    %c0_32 = arith.constant 0 : index
    %111 = vector.load %arg5[%c0_30, %c2_31, %c0_32] : memref<2x8x32xf32, #tpu.memory_space<vmem>>, vector<2x1x32xf32>
    %112 = vector.shape_cast %111 : vector<2x1x32xf32> to vector<2x32xf32>
    %113 = vector.shape_cast %110 : vector<2x32xf32> to vector<2x1x32xf32>
    tpu.vector_store %arg5[%c0_30, %c2_31, %c0_32], %113 {strides = array<i32>} : memref<2x8x32xf32, #tpu.memory_space<vmem>>, vector<2x1x32xf32>,
    %c0_33 = arith.constant 0 : index
    %c3 = arith.constant 3 : index
    %c0_34 = arith.constant 0 : index
    %114 = vector.load %arg2[%c0_33, %c3, %c0_34] : memref<2x8x96xbf16, #tpu.memory_space<vmem>>, vector<2x1x96xbf16>
    %115 = vector.shape_cast %114 : vector<2x1x96xbf16> to vector<2x96xbf16>
    %116 = arith.extf %115 : vector<2x96xbf16> to vector<2x96xf32>
    %117 = arith.truncf %110 : vector<2x32xf32> to vector<2x32xbf16>
    %cst_35 = arith.constant dense<0.000000e+00> : vector<2x96xf32>
    %118 = tpu.matmul %117, %4, %cst_35 {dimension_numbers = #tpu.dot_dimension_numbers<[1], [0], [0], [1], [0, 0, 1, 1], [], []>} : vector<2x32xbf16>, vector<32x96xbf16>, vector<2x96xf32> -> vector<2x96xf32>
    %119 = vector.broadcast %5 : vector<1x96xf32> to vector<2x96xf32>
    %120 = arith.addf %118, %119 : vector<2x96xf32>
    %121 = vector.extract_strided_slice %116 {offsets = [0, 0], sizes = [2, 32], strides = [1, 1]} : vector<2x96xf32> to vector<2x32xf32>
    %122 = vector.extract_strided_slice %120 {offsets = [0, 0], sizes = [2, 32], strides = [1, 1]} : vector<2x96xf32> to vector<2x32xf32>
    %123 = arith.addf %121, %122 : vector<2x32xf32>
    %124 = arith.negf %123 : vector<2x32xf32>
    %125 = math.exp %124 : vector<2x32xf32>
    %cst_36 = arith.constant 1.000000e+00 : f32
    %126 = vector.broadcast %cst_36 : f32 to vector<2x32xf32>
    %127 = arith.addf %126, %125 : vector<2x32xf32>
    %128 = arith.divf %126, %127 : vector<2x32xf32>
    %129 = vector.extract_strided_slice %116 {offsets = [0, 32], sizes = [2, 32], strides = [1, 1]} : vector<2x96xf32> to vector<2x32xf32>
    %130 = vector.extract_strided_slice %120 {offsets = [0, 32], sizes = [2, 32], strides = [1, 1]} : vector<2x96xf32> to vector<2x32xf32>
    %131 = arith.addf %129, %130 : vector<2x32xf32>
    %132 = arith.negf %131 : vector<2x32xf32>
    %133 = math.exp %132 : vector<2x32xf32>
    %cst_37 = arith.constant 1.000000e+00 : f32
    %134 = vector.broadcast %cst_37 : f32 to vector<2x32xf32>
    %135 = arith.addf %134, %133 : vector<2x32xf32>
    %136 = arith.divf %134, %135 : vector<2x32xf32>
    %137 = vector.extract_strided_slice %116 {offsets = [0, 64], sizes = [2, 32], strides = [1, 1]} : vector<2x96xf32> to vector<2x32xf32>
    %138 = vector.extract_strided_slice %120 {offsets = [0, 64], sizes = [2, 32], strides = [1, 1]} : vector<2x96xf32> to vector<2x32xf32>
    %139 = arith.mulf %128, %138 : vector<2x32xf32>
    %140 = arith.addf %137, %139 : vector<2x32xf32>
    %141 = math.tanh %140 : vector<2x32xf32>
    %cst_38 = arith.constant 1.000000e+00 : f32
    %142 = vector.broadcast %cst_38 : f32 to vector<2x32xf32>
    %143 = arith.subf %142, %136 : vector<2x32xf32>
    %144 = arith.mulf %143, %141 : vector<2x32xf32>
    %145 = arith.mulf %136, %110 : vector<2x32xf32>
    %146 = arith.addf %144, %145 : vector<2x32xf32>
    %c0_39 = arith.constant 0 : index
    %c3_40 = arith.constant 3 : index
    %c0_41 = arith.constant 0 : index
    %147 = vector.load %arg5[%c0_39, %c3_40, %c0_41] : memref<2x8x32xf32, #tpu.memory_space<vmem>>, vector<2x1x32xf32>
    %148 = vector.shape_cast %147 : vector<2x1x32xf32> to vector<2x32xf32>
    %149 = vector.shape_cast %146 : vector<2x32xf32> to vector<2x1x32xf32>
    tpu.vector_store %arg5[%c0_39, %c3_40, %c0_41], %149 {strides = array<i32>} : memref<2x8x32xf32, #tpu.memory_space<vmem>>, vector<2x1x32xf32>,
    %c0_42 = arith.constant 0 : index
    %c4 = arith.constant 4 : index
    %c0_43 = arith.constant 0 : index
    %150 = vector.load %arg2[%c0_42, %c4, %c0_43] : memref<2x8x96xbf16, #tpu.memory_space<vmem>>, vector<2x1x96xbf16>
    %151 = vector.shape_cast %150 : vector<2x1x96xbf16> to vector<2x96xbf16>
    %152 = arith.extf %151 : vector<2x96xbf16> to vector<2x96xf32>
    %153 = arith.truncf %146 : vector<2x32xf32> to vector<2x32xbf16>
    %cst_44 = arith.constant dense<0.000000e+00> : vector<2x96xf32>
    %154 = tpu.matmul %153, %4, %cst_44 {dimension_numbers = #tpu.dot_dimension_numbers<[1], [0], [0], [1], [0, 0, 1, 1], [], []>} : vector<2x32xbf16>, vector<32x96xbf16>, vector<2x96xf32> -> vector<2x96xf32>
    %155 = vector.broadcast %5 : vector<1x96xf32> to vector<2x96xf32>
    %156 = arith.addf %154, %155 : vector<2x96xf32>
    %157 = vector.extract_strided_slice %152 {offsets = [0, 0], sizes = [2, 32], strides = [1, 1]} : vector<2x96xf32> to vector<2x32xf32>
    %158 = vector.extract_strided_slice %156 {offsets = [0, 0], sizes = [2, 32], strides = [1, 1]} : vector<2x96xf32> to vector<2x32xf32>
    %159 = arith.addf %157, %158 : vector<2x32xf32>
    %160 = arith.negf %159 : vector<2x32xf32>
    %161 = math.exp %160 : vector<2x32xf32>
    %cst_45 = arith.constant 1.000000e+00 : f32
    %162 = vector.broadcast %cst_45 : f32 to vector<2x32xf32>
    %163 = arith.addf %162, %161 : vector<2x32xf32>
    %164 = arith.divf %162, %163 : vector<2x32xf32>
    %165 = vector.extract_strided_slice %152 {offsets = [0, 32], sizes = [2, 32], strides = [1, 1]} : vector<2x96xf32> to vector<2x32xf32>
    %166 = vector.extract_strided_slice %156 {offsets = [0, 32], sizes = [2, 32], strides = [1, 1]} : vector<2x96xf32> to vector<2x32xf32>
    %167 = arith.addf %165, %166 : vector<2x32xf32>
    %168 = arith.negf %167 : vector<2x32xf32>
    %169 = math.exp %168 : vector<2x32xf32>
    %cst_46 = arith.constant 1.000000e+00 : f32
    %170 = vector.broadcast %cst_46 : f32 to vector<2x32xf32>
    %171 = arith.addf %170, %169 : vector<2x32xf32>
    %172 = arith.divf %170, %171 : vector<2x32xf32>
    %173 = vector.extract_strided_slice %152 {offsets = [0, 64], sizes = [2, 32], strides = [1, 1]} : vector<2x96xf32> to vector<2x32xf32>
    %174 = vector.extract_strided_slice %156 {offsets = [0, 64], sizes = [2, 32], strides = [1, 1]} : vector<2x96xf32> to vector<2x32xf32>
    %175 = arith.mulf %164, %174 : vector<2x32xf32>
    %176 = arith.addf %173, %175 : vector<2x32xf32>
    %177 = math.tanh %176 : vector<2x32xf32>
    %cst_47 = arith.constant 1.000000e+00 : f32
    %178 = vector.broadcast %cst_47 : f32 to vector<2x32xf32>
    %179 = arith.subf %178, %172 : vector<2x32xf32>
    %180 = arith.mulf %179, %177 : vector<2x32xf32>
    %181 = arith.mulf %172, %146 : vector<2x32xf32>
    %182 = arith.addf %180, %181 : vector<2x32xf32>
    %c0_48 = arith.constant 0 : index
    %c4_49 = arith.constant 4 : index
    %c0_50 = arith.constant 0 : index
    %183 = vector.load %arg5[%c0_48, %c4_49, %c0_50] : memref<2x8x32xf32, #tpu.memory_space<vmem>>, vector<2x1x32xf32>
    %184 = vector.shape_cast %183 : vector<2x1x32xf32> to vector<2x32xf32>
    %185 = vector.shape_cast %182 : vector<2x32xf32> to vector<2x1x32xf32>
    tpu.vector_store %arg5[%c0_48, %c4_49, %c0_50], %185 {strides = array<i32>} : memref<2x8x32xf32, #tpu.memory_space<vmem>>, vector<2x1x32xf32>,
    %c0_51 = arith.constant 0 : index
    %c5 = arith.constant 5 : index
    %c0_52 = arith.constant 0 : index
    %186 = vector.load %arg2[%c0_51, %c5, %c0_52] : memref<2x8x96xbf16, #tpu.memory_space<vmem>>, vector<2x1x96xbf16>
    %187 = vector.shape_cast %186 : vector<2x1x96xbf16> to vector<2x96xbf16>
    %188 = arith.extf %187 : vector<2x96xbf16> to vector<2x96xf32>
    %189 = arith.truncf %182 : vector<2x32xf32> to vector<2x32xbf16>
    %cst_53 = arith.constant dense<0.000000e+00> : vector<2x96xf32>
    %190 = tpu.matmul %189, %4, %cst_53 {dimension_numbers = #tpu.dot_dimension_numbers<[1], [0], [0], [1], [0, 0, 1, 1], [], []>} : vector<2x32xbf16>, vector<32x96xbf16>, vector<2x96xf32> -> vector<2x96xf32>
    %191 = vector.broadcast %5 : vector<1x96xf32> to vector<2x96xf32>
    %192 = arith.addf %190, %191 : vector<2x96xf32>
    %193 = vector.extract_strided_slice %188 {offsets = [0, 0], sizes = [2, 32], strides = [1, 1]} : vector<2x96xf32> to vector<2x32xf32>
    %194 = vector.extract_strided_slice %192 {offsets = [0, 0], sizes = [2, 32], strides = [1, 1]} : vector<2x96xf32> to vector<2x32xf32>
    %195 = arith.addf %193, %194 : vector<2x32xf32>
    %196 = arith.negf %195 : vector<2x32xf32>
    %197 = math.exp %196 : vector<2x32xf32>
    %cst_54 = arith.constant 1.000000e+00 : f32
    %198 = vector.broadcast %cst_54 : f32 to vector<2x32xf32>
    %199 = arith.addf %198, %197 : vector<2x32xf32>
    %200 = arith.divf %198, %199 : vector<2x32xf32>
    %201 = vector.extract_strided_slice %188 {offsets = [0, 32], sizes = [2, 32], strides = [1, 1]} : vector<2x96xf32> to vector<2x32xf32>
    %202 = vector.extract_strided_slice %192 {offsets = [0, 32], sizes = [2, 32], strides = [1, 1]} : vector<2x96xf32> to vector<2x32xf32>
    %203 = arith.addf %201, %202 : vector<2x32xf32>
    %204 = arith.negf %203 : vector<2x32xf32>
    %205 = math.exp %204 : vector<2x32xf32>
    %cst_55 = arith.constant 1.000000e+00 : f32
    %206 = vector.broadcast %cst_55 : f32 to vector<2x32xf32>
    %207 = arith.addf %206, %205 : vector<2x32xf32>
    %208 = arith.divf %206, %207 : vector<2x32xf32>
    %209 = vector.extract_strided_slice %188 {offsets = [0, 64], sizes = [2, 32], strides = [1, 1]} : vector<2x96xf32> to vector<2x32xf32>
    %210 = vector.extract_strided_slice %192 {offsets = [0, 64], sizes = [2, 32], strides = [1, 1]} : vector<2x96xf32> to vector<2x32xf32>
    %211 = arith.mulf %200, %210 : vector<2x32xf32>
    %212 = arith.addf %209, %211 : vector<2x32xf32>
    %213 = math.tanh %212 : vector<2x32xf32>
    %cst_56 = arith.constant 1.000000e+00 : f32
    %214 = vector.broadcast %cst_56 : f32 to vector<2x32xf32>
    %215 = arith.subf %214, %208 : vector<2x32xf32>
    %216 = arith.mulf %215, %213 : vector<2x32xf32>
    %217 = arith.mulf %208, %182 : vector<2x32xf32>
    %218 = arith.addf %216, %217 : vector<2x32xf32>
    %c0_57 = arith.constant 0 : index
    %c5_58 = arith.constant 5 : index
    %c0_59 = arith.constant 0 : index
    %219 = vector.load %arg5[%c0_57, %c5_58, %c0_59] : memref<2x8x32xf32, #tpu.memory_space<vmem>>, vector<2x1x32xf32>
    %220 = vector.shape_cast %219 : vector<2x1x32xf32> to vector<2x32xf32>
    %221 = vector.shape_cast %218 : vector<2x32xf32> to vector<2x1x32xf32>
    tpu.vector_store %arg5[%c0_57, %c5_58, %c0_59], %221 {strides = array<i32>} : memref<2x8x32xf32, #tpu.memory_space<vmem>>, vector<2x1x32xf32>,
    %c0_60 = arith.constant 0 : index
    %c6 = arith.constant 6 : index
    %c0_61 = arith.constant 0 : index
    %222 = vector.load %arg2[%c0_60, %c6, %c0_61] : memref<2x8x96xbf16, #tpu.memory_space<vmem>>, vector<2x1x96xbf16>
    %223 = vector.shape_cast %222 : vector<2x1x96xbf16> to vector<2x96xbf16>
    %224 = arith.extf %223 : vector<2x96xbf16> to vector<2x96xf32>
    %225 = arith.truncf %218 : vector<2x32xf32> to vector<2x32xbf16>
    %cst_62 = arith.constant dense<0.000000e+00> : vector<2x96xf32>
    %226 = tpu.matmul %225, %4, %cst_62 {dimension_numbers = #tpu.dot_dimension_numbers<[1], [0], [0], [1], [0, 0, 1, 1], [], []>} : vector<2x32xbf16>, vector<32x96xbf16>, vector<2x96xf32> -> vector<2x96xf32>
    %227 = vector.broadcast %5 : vector<1x96xf32> to vector<2x96xf32>
    %228 = arith.addf %226, %227 : vector<2x96xf32>
    %229 = vector.extract_strided_slice %224 {offsets = [0, 0], sizes = [2, 32], strides = [1, 1]} : vector<2x96xf32> to vector<2x32xf32>
    %230 = vector.extract_strided_slice %228 {offsets = [0, 0], sizes = [2, 32], strides = [1, 1]} : vector<2x96xf32> to vector<2x32xf32>
    %231 = arith.addf %229, %230 : vector<2x32xf32>
    %232 = arith.negf %231 : vector<2x32xf32>
    %233 = math.exp %232 : vector<2x32xf32>
    %cst_63 = arith.constant 1.000000e+00 : f32
    %234 = vector.broadcast %cst_63 : f32 to vector<2x32xf32>
    %235 = arith.addf %234, %233 : vector<2x32xf32>
    %236 = arith.divf %234, %235 : vector<2x32xf32>
    %237 = vector.extract_strided_slice %224 {offsets = [0, 32], sizes = [2, 32], strides = [1, 1]} : vector<2x96xf32> to vector<2x32xf32>
    %238 = vector.extract_strided_slice %228 {offsets = [0, 32], sizes = [2, 32], strides = [1, 1]} : vector<2x96xf32> to vector<2x32xf32>
    %239 = arith.addf %237, %238 : vector<2x32xf32>
    %240 = arith.negf %239 : vector<2x32xf32>
    %241 = math.exp %240 : vector<2x32xf32>
    %cst_64 = arith.constant 1.000000e+00 : f32
    %242 = vector.broadcast %cst_64 : f32 to vector<2x32xf32>
    %243 = arith.addf %242, %241 : vector<2x32xf32>
    %244 = arith.divf %242, %243 : vector<2x32xf32>
    %245 = vector.extract_strided_slice %224 {offsets = [0, 64], sizes = [2, 32], strides = [1, 1]} : vector<2x96xf32> to vector<2x32xf32>
    %246 = vector.extract_strided_slice %228 {offsets = [0, 64], sizes = [2, 32], strides = [1, 1]} : vector<2x96xf32> to vector<2x32xf32>
    %247 = arith.mulf %236, %246 : vector<2x32xf32>
    %248 = arith.addf %245, %247 : vector<2x32xf32>
    %249 = math.tanh %248 : vector<2x32xf32>
    %cst_65 = arith.constant 1.000000e+00 : f32
    %250 = vector.broadcast %cst_65 : f32 to vector<2x32xf32>
    %251 = arith.subf %250, %244 : vector<2x32xf32>
    %252 = arith.mulf %251, %249 : vector<2x32xf32>
    %253 = arith.mulf %244, %218 : vector<2x32xf32>
    %254 = arith.addf %252, %253 : vector<2x32xf32>
    %c0_66 = arith.constant 0 : index
    %c6_67 = arith.constant 6 : index
    %c0_68 = arith.constant 0 : index
    %255 = vector.load %arg5[%c0_66, %c6_67, %c0_68] : memref<2x8x32xf32, #tpu.memory_space<vmem>>, vector<2x1x32xf32>
    %256 = vector.shape_cast %255 : vector<2x1x32xf32> to vector<2x32xf32>
    %257 = vector.shape_cast %254 : vector<2x32xf32> to vector<2x1x32xf32>
    tpu.vector_store %arg5[%c0_66, %c6_67, %c0_68], %257 {strides = array<i32>} : memref<2x8x32xf32, #tpu.memory_space<vmem>>, vector<2x1x32xf32>,
    %c0_69 = arith.constant 0 : index
    %c7 = arith.constant 7 : index
    %c0_70 = arith.constant 0 : index
    %258 = vector.load %arg2[%c0_69, %c7, %c0_70] : memref<2x8x96xbf16, #tpu.memory_space<vmem>>, vector<2x1x96xbf16>
    %259 = vector.shape_cast %258 : vector<2x1x96xbf16> to vector<2x96xbf16>
    %260 = arith.extf %259 : vector<2x96xbf16> to vector<2x96xf32>
    %261 = arith.truncf %254 : vector<2x32xf32> to vector<2x32xbf16>
    %cst_71 = arith.constant dense<0.000000e+00> : vector<2x96xf32>
    %262 = tpu.matmul %261, %4, %cst_71 {dimension_numbers = #tpu.dot_dimension_numbers<[1], [0], [0], [1], [0, 0, 1, 1], [], []>} : vector<2x32xbf16>, vector<32x96xbf16>, vector<2x96xf32> -> vector<2x96xf32>
    %263 = vector.broadcast %5 : vector<1x96xf32> to vector<2x96xf32>
    %264 = arith.addf %262, %263 : vector<2x96xf32>
    %265 = vector.extract_strided_slice %260 {offsets = [0, 0], sizes = [2, 32], strides = [1, 1]} : vector<2x96xf32> to vector<2x32xf32>
    %266 = vector.extract_strided_slice %264 {offsets = [0, 0], sizes = [2, 32], strides = [1, 1]} : vector<2x96xf32> to vector<2x32xf32>
    %267 = arith.addf %265, %266 : vector<2x32xf32>
    %268 = arith.negf %267 : vector<2x32xf32>
    %269 = math.exp %268 : vector<2x32xf32>
    %cst_72 = arith.constant 1.000000e+00 : f32
    %270 = vector.broadcast %cst_72 : f32 to vector<2x32xf32>
    %271 = arith.addf %270, %269 : vector<2x32xf32>
    %272 = arith.divf %270, %271 : vector<2x32xf32>
    %273 = vector.extract_strided_slice %260 {offsets = [0, 32], sizes = [2, 32], strides = [1, 1]} : vector<2x96xf32> to vector<2x32xf32>
    %274 = vector.extract_strided_slice %264 {offsets = [0, 32], sizes = [2, 32], strides = [1, 1]} : vector<2x96xf32> to vector<2x32xf32>
    %275 = arith.addf %273, %274 : vector<2x32xf32>
    %276 = arith.negf %275 : vector<2x32xf32>
    %277 = math.exp %276 : vector<2x32xf32>
    %cst_73 = arith.constant 1.000000e+00 : f32
    %278 = vector.broadcast %cst_73 : f32 to vector<2x32xf32>
    %279 = arith.addf %278, %277 : vector<2x32xf32>
    %280 = arith.divf %278, %279 : vector<2x32xf32>
    %281 = vector.extract_strided_slice %260 {offsets = [0, 64], sizes = [2, 32], strides = [1, 1]} : vector<2x96xf32> to vector<2x32xf32>
    %282 = vector.extract_strided_slice %264 {offsets = [0, 64], sizes = [2, 32], strides = [1, 1]} : vector<2x96xf32> to vector<2x32xf32>
    %283 = arith.mulf %272, %282 : vector<2x32xf32>
    %284 = arith.addf %281, %283 : vector<2x32xf32>
    %285 = math.tanh %284 : vector<2x32xf32>
    %cst_74 = arith.constant 1.000000e+00 : f32
    %286 = vector.broadcast %cst_74 : f32 to vector<2x32xf32>
    %287 = arith.subf %286, %280 : vector<2x32xf32>
    %288 = arith.mulf %287, %285 : vector<2x32xf32>
    %289 = arith.mulf %280, %254 : vector<2x32xf32>
    %290 = arith.addf %288, %289 : vector<2x32xf32>
    %c0_75 = arith.constant 0 : index
    %c7_76 = arith.constant 7 : index
    %c0_77 = arith.constant 0 : index
    %291 = vector.load %arg5[%c0_75, %c7_76, %c0_77] : memref<2x8x32xf32, #tpu.memory_space<vmem>>, vector<2x1x32xf32>
    %292 = vector.shape_cast %291 : vector<2x1x32xf32> to vector<2x32xf32>
    %293 = vector.shape_cast %290 : vector<2x32xf32> to vector<2x1x32xf32>
    tpu.vector_store %arg5[%c0_75, %c7_76, %c0_77], %293 {strides = array<i32>} : memref<2x8x32xf32, #tpu.memory_space<vmem>>, vector<2x1x32xf32>,
    %c0_78 = arith.constant 0 : index
    %c0_79 = arith.constant 0 : index
    %294 = vector.load %arg6[%c0_78, %c0_79] : memref<2x32xf32, #tpu.memory_space<vmem>>, vector<2x32xf32>
    tpu.vector_store %arg6[%c0_78, %c0_79], %290 {strides = array<i32>} : memref<2x32xf32, #tpu.memory_space<vmem>>, vector<2x32xf32>,
    return
  }
  func.func @transform_0(%arg0: i32, %arg1: i32) -> (i32, i32, i32) {
    %c0_i32 = arith.constant 0 : i32
    %c0_i32_0 = arith.constant 0 : i32
    return %arg0, %arg1, %c0_i32 : i32, i32, i32
  }
  func.func @transform_1(%arg0: i32, %arg1: i32) -> (i32, i32) {
    %c0_i32 = arith.constant 0 : i32
    %c0_i32_0 = arith.constant 0 : i32
    %c0_i32_1 = arith.constant 0 : i32
    return %c0_i32, %c0_i32_0 : i32, i32
  }
  func.func @transform_2(%arg0: i32, %arg1: i32) -> (i32, i32) {
    %c0_i32 = arith.constant 0 : i32
    %c0_i32_0 = arith.constant 0 : i32
    %c0_i32_1 = arith.constant 0 : i32
    return %c0_i32, %c0_i32_0 : i32, i32
  }
  func.func @transform_3(%arg0: i32, %arg1: i32) -> (i32, i32, i32) {
    %c0_i32 = arith.constant 0 : i32
    %c0_i32_0 = arith.constant 0 : i32
    return %arg0, %arg1, %c0_i32 : i32, i32, i32
  }
}

</mosaic_0001>

<bundles_post_ra>
// kernel: cpc_encoder_forward.3
= control target key start
LH: loop header
LB: loop body
LE: loop exit
PB: predicated region body
PF: predicated region fallthrough
CT: control target
= control target key end

     0   :  { %vm36_vm0 = vcmask 1043456   ;;  %vm32_vm1 = vcmask 64512   ;;  %s208_s0 = inlined_call_operand.vmem [shape: f32[16,8], index: 0, kind: input, shape index: {}]   ;;  %s209_s1 = inlined_call_operand.vmem [shape: bf16[8,16], index: 1, kind: input, shape index: {}]   ;;  %s210_s2 = inlined_call_operand.vmem [shape: f32[1,16], index: 2, kind: input, shape index: {}]   ;;  %s211_s3 = inlined_call_operand.vmem [shape: bf16[8,96], index: 3, kind: input, shape index: {}]   ;;  %s212_s4 = inlined_call_operand.vmem [shape: f32[1,96], index: 4, kind: input, shape index: {}]   ;;  %s213_s5 = inlined_call_operand.hbm [shape: f32[16,16], index: 5, kind: output, shape index: {0}]   ;;  %s214_s6 = inlined_call_operand.vmem [shape: bf16[16,96], index: 6, kind: output, shape index: {1}]  }
   0x1   :  { %v27_v0 = vld [vmem:[%s209_s1] sm:$0xf]  ;;  %v25_v5 = vld [vmem:[%s208_s0 + $0x8] sm:$0xff] }
   0x2   :  { %v57_v1 = vld [vmem:[%s211_s3] sm:$0xf]  ;;  %v38_v3 = vsel %vm36_vm0, %v27_v0, 0 }
   0x3   :  { %v24_v2 = vld [vmem:[%s208_s0] sm:$0xff]  ;;  %v63_v4 = vsel %vm36_vm0, %v57_v1, 0  ;;  %47 = vmatpush.bf16.msra.mxu0 %v38_v3 }
   0x4   :  { %72 = vmatpush.bf16.msra.mxu1 %v63_v4  ;;  %v26_v6 = vpack.c.bf16 %v25_v5, %v24_v2 }
   0x5   :  { %12 = vsyncpa [#allocation3], 0  ;;  %v111_v7 = vld [vmem:[%s210_s2] ss:$0 sm:$0xff]  ;;  %vm54_vm2 = vcmask 130048   ;;  %vm81_vm3 = vcmask 781312  }
   0x6   :  { %106 = vmatmul.msk.bf16.vlgmr.msra.gmra.mxu0 %vm32_vm1, %v26_v6  ;;  %v112_v8 = vld [vmem:[%s212_s4] ss:$0 sm:$0xff]  ;;  %s139_s8 = smov [#allocation2]   ;;  %s90_s4 = sshll.u32 %s213_s5, 4  ;;  %s91_s4 = int_to_ptr.hbm [resolvable:$true] %s90_s4 }
   0x7   :  { %107 = vmatmul.msk.bf16.vlgmr.msra.gmra.mxu1 %vm32_vm1, %v26_v6  ;;  %s88_s2 = sshll.u32 %s139_s8, 4  ;;  %s140_s11 = smov 128   ;;  %s89_s2 = int_to_ptr.vmem [resolvable:$true] %s88_s2 }
   0x8   :  { %s141_s12 = smov 8  }
  0x83   :  { %v49_v9 = vpop.f32.mrf.mxu0 }
  0x84   :  { %v74_v10 = vpop.f32.mrf.mxu1  ;;  %v50_v11 = vadd.f32 %v111_v7, %v49_v9 }
  0x85   :  { %v75_v12 = vadd.f32 %v112_v8, %v74_v10 }
  0x86   :  { %55 = vst.msk [vmem:[#allocation2] sm:$0xff] %vm54_vm2, %v50_v11 }
  0x87   :  { %v79_v13 = vpack.c.bf16 %v75_v12, %v75_v12 }
  0x89   :  { %82 = vst.msk [vmem:[%s214_s6] sm:$0xf] %vm81_vm3, %v79_v13 }
  0x8b   :  { %v51_v14 = vpop.f32.mrf.mxu0 }
  0x8c   :  { %v76_v15 = vpop.f32.mrf.mxu1  ;;  %v52_v16 = vadd.f32 %v111_v7, %v51_v14 }
  0x8d   :  { %v77_v17 = vadd.f32 %v112_v8, %v76_v15 }
  0x8e   :  { %56 = vst.msk [vmem:[#allocation2 + $0x8] sm:$0xff] %vm54_vm2, %v52_v16 }
  0x8f   :  { %v80_v18 = vpack.c.bf16 %v77_v17, %v77_v17  ;;  %96 = dma.vmem_to_hbm [thread:$0]  %s89_s2, 256, %s91_s4, [#allocation3], %s140_s11, %s140_s11, %s141_s12  }
  0x91   :  { %83 = vst.msk [vmem:[%s214_s6 + $0x4] sm:$0xf] %vm81_vm3, %v80_v18 }
  0x92   :  { %137 = dma.done.wait [#allocation3], 256  }
  0x93   :  { %138 = vsyncadd [#allocation3], 4294967040 }
  0x94   :  { %105 = vsyncpa [#allocation3], 1 }

// kernel: cpc_encoder_forward.5
= control target key start
LH: loop header
LB: loop body
LE: loop exit
PB: predicated region body
PF: predicated region fallthrough
CT: control target
= control target key end

     0   :  { %vm38_vm0 = vcmask 261120   ;;  %vm56_vm1 = vcmask 392192   ;;  %s116_s1 = inlined_call_operand.vmem [shape: bf16[32,48], index: 1, kind: input, shape index: {}]   ;;  %s117_s0 = inlined_call_operand.vmem [shape: f32[16,32], index: 0, kind: input, shape index: {}]   ;;  %s118_s2 = inlined_call_operand.vmem [shape: f32[1,48], index: 2, kind: input, shape index: {}]   ;;  %s119_s3 = inlined_call_operand.vmem [shape: f32[16,48], index: 3, kind: output, shape index: {}]  }
   0x1   :  { %v73_v0 = vld [vmem:[%s116_s1 + $0x8] sm:$0xff]  ;;  %v72_v1 = vld [vmem:[%s116_s1] sm:$0xff] }
   0x2   :  { %48 = vmatpush.bf16.msra.mxu0 %v73_v0  ;;  %v15_v2 = vld [vmem:[%s117_s0] sm:$0xff]  ;;  %v16_v3 = vld [vmem:[%s117_s0 + $0x8] sm:$0xff] }
   0x3   :  { %v17_v4 = vpack.c.bf16 %v16_v3, %v15_v2  ;;  %v74_v5 = vld [vmem:[%s118_s2] ss:$0 sm:$0xff] }
   0x6   :  { %49 = vmatpush.bf16.msra.mxu0 %v72_v1 }
   0x9   :  { %71 = vmatmul.msk.bf16.vlgmr.msra.gmra.mxu0 %vm38_vm0, %v17_v4 }
  0x86   :  { %v51_v6 = vpop.f32.mrf.mxu0 }
  0x87   :  { %v52_v7 = vadd.f32 %v74_v5, %v51_v6 }
  0x89   :  { %57 = vst.msk [vmem:[%s119_s3] sm:$0xff] %vm56_vm1, %v52_v7 }
  0x8e   :  { %v53_v8 = vpop.f32.mrf.mxu0 }
  0x8f   :  { %v54_v9 = vadd.f32 %v74_v5, %v53_v8 }
  0x91   :  { %58 = vst.msk [vmem:[%s119_s3 + $0x8] sm:$0xff] %vm56_vm1, %v54_v9 }

// kernel: cpc_encoder_forward.4
= control target key start
LH: loop header
LB: loop body
LE: loop exit
PB: predicated region body
PF: predicated region fallthrough
CT: control target
= control target key end

     0   :  { %vm19_vm0 = vcmask 254976   ;;  %v1203_v1 = vmov 0.0   ;;  %vm47_vm1 = vcmask 261120   ;;  %s1204_s17 = smov 64   ;;  %s1205_s22 = smov 32   ;;  %vm174_vm10 = vcmask 1041409   ;;  %s1538_s1 = inlined_call_operand.vmem [shape: bf16[32,96], index: 1, kind: input, shape index: {}]   ;;  %s1539_s2 = inlined_call_operand.vmem [shape: f32[1,96], index: 2, kind: input, shape index: {}]   ;;  %s1540_s0 = inlined_call_operand.vmem [shape: bf16[2,8,96], index: 0, kind: input, shape index: {}]   ;;  %s1541_s3 = inlined_call_operand.vmem [shape: f32[2,8,32], index: 3, kind: output, shape index: {}]  }
   0x1   :  { %v1100_v0 = vld [vmem:[%s1538_s1 + $0x8] sm:$0xff]  ;;  %20 = vst.msk [vmem:[#allocation2] sm:$0x3] %vm19_vm0, %v1203_v1  ;;  %v1099_v2 = vld [vmem:[%s1538_s1] sm:$0xff]  ;;  %s1206_s23 = smov 96  }
   0x2   :  { %57 = vmatpush.bf16.msra.mxu0 %v1100_v0  ;;  %188 = vmatpush.bf16.msra.mxu1 %v1100_v0  ;;  %v1241_v5 = vld [vmem:[%s1539_s2] ss:$0 sm:$0xff]  ;;  %v28_v10 = vld [vmem:[%s1540_s0 + $0x4] sm:$0x1] }
   0x3   :  { %314 = vmatpush.bf16.msra.mxu2 %v1100_v0  ;;  %442 = vmatpush.bf16.msra.mxu3 %v1100_v0  ;;  %v30_v11 = vunpack.c.l.bf16 %v28_v10  ;;  %v27_v13 = vld [vmem:[%s1540_s0] sm:$0x1] }
   0x4   :  { %v29_v14 = vunpack.c.l.bf16 %v27_v13 }
   0x6   :  { %58 = vmatpush.bf16.msra.mxu0 %v1099_v2  ;;  %189 = vmatpush.bf16.msra.mxu1 %v1099_v2 }
   0x7   :  { %315 = vmatpush.bf16.msra.mxu2 %v1099_v2  ;;  %443 = vmatpush.bf16.msra.mxu3 %v1099_v2 }
   0x8   :  { %v1233_v3 = vld [vmem:[#allocation2] sm:$0x3] }
   0x9   :  { %v31_v4 = vpack.c.bf16 %v1233_v3, %v1233_v3  ;;  %v141_v51 = vrot.slane %v1233_v3, 1 }
   0xa   :  { %570 = vmatpush.bf16.msrb.mxu0 %v1100_v0  ;;  %698 = vmatpush.bf16.msrb.mxu1 %v1100_v0 }
   0xb   :  { %826 = vmatpush.bf16.msrb.mxu2 %v1100_v0  ;;  %954 = vmatpush.bf16.msrb.mxu3 %v1100_v0 }
   0xc   :  { %1075 = vmatmul.msk.bf16.vlgmr.msra.gmra.mxu0 %vm47_vm1, %v31_v4 }
   0xe   :  { %571 = vmatpush.bf16.msrb.mxu0 %v1099_v2  ;;  %699 = vmatpush.bf16.msrb.mxu1 %v1099_v2 }
   0xf   :  { %827 = vmatpush.bf16.msrb.mxu2 %v1099_v2  ;;  %955 = vmatpush.bf16.msrb.mxu3 %v1099_v2 }
  0x89   :  { %v60_v6 = vpop.f32.mrf.mxu0 }
  0x8a   :  { %v61_v7 = vadd.f32 %v1241_v5, %v60_v6 }
  0x8c   :  { %v65_v8 = vrot.slane %v61_v7, 1  ;;  %v68_v16 = vadd.f32 %v61_v7, %v29_v14 }
  0x8e   :  { %110 = vrot.lane.b32.xlu0 %v65_v8, %s1204_s17  ;;  %v69_v12 = vadd.f32 %v65_v8, %v30_v11  ;;  %v1076_v17 = vmul.f32 -1.442695, %v68_v16 }
  0x90   :  { %v1077_v15 = vmul.f32 -1.442695, %v69_v12 }
  0x91   :  { %v62_v9 = vpop.f32.mrf.mxu0 }
  0x92   :  { %1106 = vpow2.f32 %v1077_v15  ;;  %v163_v15 = vld [vmem:[%s1540_s0] sm:$0x1] }
  0x93   :  { %1108 = vpow2.f32 %v1076_v17  ;;  %v165_v17 = vunpack.c.l.bf16 %v163_v15 }
  0x96   :  { %108 = vrot.lane.b32.xlu0 %v61_v7, %s1204_s17 }
  0x98   :  { %v1107_v18 = vpop.eup %1106 }
  0x99   :  { %v77_v19 = vadd.f32 1.0, %v1107_v18  ;;  %v1109_v20 = vpop.eup %1108 }
  0x9a   :  { %v76_v21 = vadd.f32 1.0, %v1109_v20 }
  0x9b   :  { %1110 = vrcp.f32 %v77_v19  ;;  %v104_v30 = vand.u32 2147483648, %v77_v19  ;;  %vm98_vm3 = vweird.f32 %v77_v19  ;;  %v102_v31 = vand.u32 2147483647, %v77_v19 }
  0x9c   :  { %1112 = vrcp.f32 %v76_v21  ;;  %v89_v39 = vand.u32 2147483648, %v76_v21  ;;  %vm83_vm7 = vweird.f32 %v76_v21  ;;  %v87_v40 = vand.u32 2147483647, %v76_v21 }
  0x9d   :  { %v105_v34 = vor.u32 1.1754944e-38, %v104_v30  ;;  %vm103_vm5 = vcmp.eq.f32.partialorder %v102_v31, 8.507059e+37 }
  0x9e   :  { %v90_v42 = vor.u32 1.1754944e-38, %v89_v39  ;;  %vm88_vm9 = vcmp.eq.f32.partialorder %v87_v40, 8.507059e+37 }
  0xa1   :  { %v1111_v22 = vpop.eup %1110 }
  0xa2   :  { %v94_v23 = vmul.f32 %v1111_v22, %v77_v19  ;;  %v1113_v25 = vpop.eup %1112  ;;  %vm99_vm2 = vweird.f32 %v1111_v22 }
  0xa3   :  { %v79_v27 = vmul.f32 %v1113_v25, %v76_v21  ;;  %vm100_vm4 = vmor %vm98_vm3, %vm99_vm2  ;;  %vm84_vm6 = vweird.f32 %v1113_v25 }
  0xa4   :  { %v95_v24 = vsub.f32 1.0, %v94_v23  ;;  %vm85_vm8 = vmor %vm83_vm7, %vm84_vm6 }
  0xa5   :  { %v80_v29 = vsub.f32 1.0, %v79_v27 }
  0xa6   :  { %v96_v26 = vmul.f32 %v1111_v22, %v95_v24 }
  0xa7   :  { %v81_v33 = vmul.f32 %v1113_v25, %v80_v29 }
  0xa8   :  { %v97_v28 = vadd.f32 %v1111_v22, %v96_v26 }
  0xa9   :  { %v82_v38 = vadd.f32 %v1113_v25, %v81_v33 }
  0xaa   :  { %v101_v32 = vsel %vm100_vm4, %v1111_v22, %v97_v28 }
  0xab   :  { %v106_v36 = vsel %vm103_vm5, %v105_v34, %v101_v32  ;;  %v86_v41 = vsel %vm85_vm8, %v1113_v25, %v82_v38 }
  0xac   :  { %v91_v44 = vsel %vm88_vm9, %v90_v42, %v86_v41  ;;  %v129_v55 = vsub.f32 1.0, %v106_v36 }
  0xad   :  { %v128_v61 = vsub.f32 1.0, %v91_v44 }
 0x100   :  { %v111_v35 = vpop.permute.xlu0 %110 }
 0x101   :  { %v115_v37 = vmul.f32 %v111_v35, %v106_v36 }
 0x103   :  { %120 = vrot.lane.b32.xlu1 %v115_v37, %s1204_s17 }
 0x108   :  { %v109_v43 = vpop.permute.xlu0 %108 }
 0x109   :  { %v114_v45 = vmul.f32 %v109_v43, %v91_v44 }
 0x10b   :  { %118 = vrot.lane.b32.xlu1 %v114_v45, %s1204_s17 }
 0x113   :  { %142 = vrot.lane.b32.xlu1 %v1233_v3, %s1205_s22 }
 0x175   :  { %v121_v46 = vpop.permute.xlu1 %120 }
 0x176   :  { %v125_v47 = vadd.f32 %v121_v46, %v30_v11 }
 0x178   :  { %1114 = vtanh.f32 %v125_v47 }
 0x17d   :  { %v119_v48 = vpop.permute.xlu1 %118 }
 0x17e   :  { %v1115_v49 = vpop.eup %1114  ;;  %v124_v50 = vadd.f32 %v119_v48, %v29_v14  ;;  %v164_v14 = vld [vmem:[%s1540_s0 + $0x4] sm:$0x1] }
 0x17f   :  { %134 = vrot.lane.b32.xlu2 %v1115_v49, %s1206_s23  ;;  %v166_v16 = vunpack.c.l.bf16 %v164_v14 }
 0x180   :  { %1116 = vtanh.f32 %v124_v50 }
 0x185   :  { %v143_v59 = vpop.permute.xlu1 %142 }
 0x186   :  { %v1117_v52 = vpop.eup %1116  ;;  %v148_v63 = vmul.f32 %v143_v59, %v91_v44 }
 0x187   :  { %144 = vrot.lane.b32.xlu2 %v141_v51, %s1205_s22  ;;  %132 = vrot.lane.b32.xlu0 %v1117_v52, %s1206_s23 }
 0x1d9   :  { %v135_v53 = vpop.permute.xlu2 %134 }
 0x1da   :  { %v139_v57 = vmul.f32 %v135_v53, %v129_v55 }
 0x1e1   :  { %v145_v54 = vpop.permute.xlu2 %144 }
 0x1e2   :  { %v149_v56 = vmul.f32 %v145_v54, %v106_v36 }
 0x1e4   :  { %v1258_v58 = vadd.f32 %v149_v56, %v139_v57 }
 0x1e6   :  { %v168_v60 = vpack.c.bf16 %v1258_v58, %v1258_v58  ;;  %v272_v57 = vrot.slane %v1258_v58, 7 }
 0x1e8   :  { %v172_v1 = vunpack.c.l.b16 %v168_v60 }
 0x1ea   :  { %v173_v4 = vrot.slane %v172_v1, 7 }
 0x1f9   :  { %v133_v62 = vpop.permute.xlu0 %132 }
 0x1fa   :  { %v138_v0 = vmul.f32 %v133_v62, %v128_v61 }
 0x1fc   :  { %v1262_v2 = vadd.f32 %v148_v63, %v138_v0 }
 0x1fe   :  { %v167_v3 = vpack.c.bf16 %v1262_v2, %v1262_v2  ;;  %v271_v63 = vrot.slane %v1262_v2, 7 }
 0x200   :  { %v171_v6 = vunpack.c.l.b16 %v167_v3 }
 0x202   :  { %v175_v7 = vsel %vm174_vm10, %v173_v4, %v171_v6 }
 0x203   :  { %v176_v8 = vpack.c.b16 %v175_v7, %v175_v7 }
 0x205   :  { %177 = vrot.lane.b32.xlu2 %v176_v8, %s1206_s23 }
 0x25f   :  { %v178_v9 = vpop.permute.xlu2 %177 }
 0x260   :  { %1078 = vmatmul.msk.bf16.vlgmr.msra.gmra.mxu1 %vm47_vm1, %v178_v9 }
 0x2dd   :  { %v191_v10 = vpop.f32.mrf.mxu1 }
 0x2de   :  { %v192_v11 = vadd.f32 %v1241_v5, %v191_v10 }
 0x2e0   :  { %241 = vrot.lane.b32.xlu1 %v192_v11, %s1204_s17  ;;  %v196_v12 = vrot.slane %v192_v11, 7  ;;  %v200_v18 = vadd.f32 %v192_v11, %v166_v16 }
 0x2e2   :  { %239 = vrot.lane.b32.xlu0 %v196_v12, %s1204_s17  ;;  %v199_v19 = vadd.f32 %v196_v12, %v165_v17  ;;  %v1080_v20 = vmul.f32 -1.442695, %v200_v18 }
 0x2e4   :  { %v1079_v21 = vmul.f32 -1.442695, %v199_v19  ;;  %1118 = vpow2.f32 %v1080_v20  ;;  %v291_v20 = vld [vmem:[%s1540_s0 + $0x4] sm:$0x2] }
 0x2e5   :  { %v193_v13 = vpop.f32.mrf.mxu1 }
 0x2e6   :  { %1120 = vpow2.f32 %v1079_v21  ;;  %v293_v21 = vunpack.c.l.bf16 %v291_v20 }
 0x2ea   :  { %v1119_v22 = vpop.eup %1118 }
 0x2eb   :  { %v208_v24 = vadd.f32 1.0, %v1119_v22 }
 0x2ec   :  { %v1121_v23 = vpop.eup %1120 }
 0x2ed   :  { %v207_v25 = vadd.f32 1.0, %v1121_v23  ;;  %1122 = vrcp.f32 %v208_v24  ;;  %v235_v35 = vand.u32 2147483648, %v208_v24  ;;  %vm229_vm12 = vweird.f32 %v208_v24 }
 0x2ee   :  { %v233_v36 = vand.u32 2147483647, %v208_v24 }
 0x2ef   :  { %1124 = vrcp.f32 %v207_v25  ;;  %v220_v38 = vand.u32 2147483648, %v207_v25  ;;  %vm214_vm15 = vweird.f32 %v207_v25  ;;  %v218_v40 = vand.u32 2147483647, %v207_v25 }
 0x2f0   :  { %v236_v41 = vor.u32 1.1754944e-38, %v235_v35  ;;  %vm234_vm2 = vcmp.eq.f32.partialorder %v233_v36, 8.507059e+37 }
 0x2f1   :  { %v221_v45 = vor.u32 1.1754944e-38, %v220_v38  ;;  %vm219_vm3 = vcmp.eq.f32.partialorder %v218_v40, 8.507059e+37 }
 0x2f3   :  { %v1123_v26 = vpop.eup %1122 }
 0x2f4   :  { %v225_v28 = vmul.f32 %v1123_v26, %v208_v24  ;;  %vm230_vm11 = vweird.f32 %v1123_v26 }
 0x2f5   :  { %v1125_v27 = vpop.eup %1124  ;;  %vm231_vm14 = vmor %vm229_vm12, %vm230_vm11 }
 0x2f6   :  { %v210_v29 = vmul.f32 %v1125_v27, %v207_v25  ;;  %v226_v30 = vsub.f32 1.0, %v225_v28  ;;  %vm215_vm13 = vweird.f32 %v1125_v27  ;;  %v290_v25 = vld [vmem:[%s1540_s0] sm:$0x2] }
 0x2f7   :  { %vm216_vm0 = vmor %vm214_vm15, %vm215_vm13 }
 0x2f8   :  { %v211_v31 = vsub.f32 1.0, %v210_v29  ;;  %v227_v32 = vmul.f32 %v1123_v26, %v226_v30 }
 0x2fa   :  { %v212_v33 = vmul.f32 %v1125_v27, %v211_v31  ;;  %v228_v34 = vadd.f32 %v1123_v26, %v227_v32 }
 0x2fc   :  { %v213_v37 = vadd.f32 %v1125_v27, %v212_v33  ;;  %v232_v39 = vsel %vm231_vm14, %v1123_v26, %v228_v34 }
 0x2fd   :  { %v237_v44 = vsel %vm234_vm2, %v236_v41, %v232_v39 }
 0x2fe   :  { %v217_v42 = vsel %vm216_vm0, %v1125_v27, %v213_v37  ;;  %v260_v56 = vsub.f32 1.0, %v237_v44  ;;  %v276_v60 = vmul.f32 %v272_v57, %v237_v44  ;;  %v292_v27 = vunpack.c.l.bf16 %v290_v25 }
 0x2ff   :  { %v222_v48 = vsel %vm219_vm3, %v221_v45, %v217_v42 }
 0x300   :  { %v259_v62 = vsub.f32 1.0, %v222_v48  ;;  %v275_v3 = vmul.f32 %v271_v63, %v222_v48 }
 0x352   :  { %v242_v43 = vpop.permute.xlu1 %241 }
 0x353   :  { %v246_v46 = vmul.f32 %v242_v43, %v237_v44 }
 0x354   :  { %v240_v47 = vpop.permute.xlu0 %239 }
 0x355   :  { %v245_v49 = vmul.f32 %v240_v47, %v222_v48  ;;  %251 = vrot.lane.b32.xlu0 %v246_v46, %s1204_s17 }
 0x357   :  { %249 = vrot.lane.b32.xlu2 %v245_v49, %s1204_s17 }
 0x3b1   :  { %v250_v50 = vpop.permute.xlu2 %249 }
 0x3b2   :  { %v255_v51 = vadd.f32 %v250_v50, %v165_v17 }
 0x3b4   :  { %1126 = vtanh.f32 %v255_v51 }
 0x3ba   :  { %v1127_v52 = vpop.eup %1126 }
 0x3bb   :  { %263 = vrot.lane.b32.xlu1 %v1127_v52, %s1206_s23 }
 0x3c7   :  { %v252_v53 = vpop.permute.xlu0 %251 }
 0x3c8   :  { %v256_v54 = vadd.f32 %v252_v53, %v166_v16 }
 0x3ca   :  { %1128 = vtanh.f32 %v256_v54 }
 0x3d0   :  { %v1129_v55 = vpop.eup %1128 }
 0x3d1   :  { %265 = vrot.lane.b32.xlu2 %v1129_v55, %s1206_s23 }
 0x42b   :  { %v266_v59 = vpop.permute.xlu2 %265 }
 0x42c   :  { %v270_v61 = vmul.f32 %v266_v59, %v260_v56 }
 0x42d   :  { %v264_v0 = vpop.permute.xlu1 %263 }
 0x42e   :  { %v1284_v1 = vadd.f32 %v276_v60, %v270_v61  ;;  %v269_v4 = vmul.f32 %v264_v0, %v259_v62 }
 0x430   :  { %v1286_v6 = vadd.f32 %v275_v3, %v269_v4  ;;  %v295_v7 = vpack.c.bf16 %v1284_v1, %v1284_v1  ;;  %v399_v4 = vrot.slane %v1284_v1, 7 }
 0x432   :  { %v294_v8 = vpack.c.bf16 %v1286_v6, %v1286_v6  ;;  %v299_v10 = vunpack.c.l.b16 %v295_v7  ;;  %v398_v0 = vrot.slane %v1286_v6, 7 }
 0x434   :  { %v298_v9 = vunpack.c.l.b16 %v294_v8 }
 0x436   :  { %v300_v11 = vrot.slane %v298_v9, 1 }
 0x438   :  { %v301_v12 = vsel %vm174_vm10, %v299_v10, %v300_v11 }
 0x439   :  { %v302_v13 = vpack.c.b16 %v301_v12, %v301_v12 }
 0x43b   :  { %303 = vrot.lane.b32.xlu0 %v302_v13, %s1206_s23 }
 0x4ad   :  { %v304_v14 = vpop.permute.xlu0 %303 }
 0x4ae   :  { %1081 = vmatmul.msk.bf16.vlgmr.msra.gmra.mxu2 %vm47_vm1, %v304_v14 }
 0x531   :  { %v317_v15 = vpop.f32.mrf.mxu2 }
 0x532   :  { %v318_v16 = vadd.f32 %v1241_v5, %v317_v15 }
 0x534   :  { %v322_v17 = vrot.slane %v318_v16, 6  ;;  %v323_v18 = vrot.slane %v318_v16, 7 }
 0x536   :  { %368 = vrot.lane.b32.xlu2 %v323_v18, %s1204_s17  ;;  %366 = vrot.lane.b32.xlu1 %v322_v17, %s1204_s17  ;;  %v327_v22 = vadd.f32 %v323_v18, %v293_v21  ;;  %v326_v28 = vadd.f32 %v322_v17, %v292_v27 }
 0x538   :  { %v1083_v23 = vmul.f32 -1.442695, %v327_v22  ;;  %v1082_v30 = vmul.f32 -1.442695, %v326_v28 }
 0x539   :  { %v319_v19 = vpop.f32.mrf.mxu2 }
 0x53a   :  { %1130 = vpow2.f32 %v1083_v23 }
 0x540   :  { %v1131_v24 = vpop.eup %1130 }
 0x541   :  { %v335_v26 = vadd.f32 1.0, %v1131_v24 }
 0x543   :  { %1132 = vrcp.f32 %v335_v26  ;;  %v362_v37 = vand.u32 2147483648, %v335_v26  ;;  %vm356_vm5 = vweird.f32 %v335_v26  ;;  %v360_v38 = vand.u32 2147483647, %v335_v26 }
 0x544   :  { %1134 = vpow2.f32 %v1082_v30 }
 0x545   :  { %v363_v40 = vor.u32 1.1754944e-38, %v362_v37  ;;  %vm361_vm7 = vcmp.eq.f32.partialorder %v360_v38, 8.507059e+37 }
 0x549   :  { %v1133_v29 = vpop.eup %1132 }
 0x54a   :  { %v352_v31 = vmul.f32 %v1133_v29, %v335_v26  ;;  %v1135_v33 = vpop.eup %1134  ;;  %vm357_vm4 = vweird.f32 %v1133_v29 }
 0x54b   :  { %v334_v35 = vadd.f32 1.0, %v1135_v33  ;;  %vm358_vm6 = vmor %vm356_vm5, %vm357_vm4 }
 0x54c   :  { %v353_v32 = vsub.f32 1.0, %v352_v31 }
 0x54d   :  { %1136 = vrcp.f32 %v334_v35  ;;  %v347_v49 = vand.u32 2147483648, %v334_v35  ;;  %vm341_vm9 = vweird.f32 %v334_v35  ;;  %v345_v50 = vand.u32 2147483647, %v334_v35 }
 0x54e   :  { %v354_v34 = vmul.f32 %v1133_v29, %v353_v32 }
 0x54f   :  { %v348_v52 = vor.u32 1.1754944e-38, %v347_v49  ;;  %vm346_vm12 = vcmp.eq.f32.partialorder %v345_v50, 8.507059e+37 }
 0x550   :  { %v355_v36 = vadd.f32 %v1133_v29, %v354_v34  ;;  %v418_v34 = vld [vmem:[%s1540_s0 + $0x4] sm:$0x2] }
 0x552   :  { %v359_v39 = vsel %vm358_vm6, %v1133_v29, %v355_v36  ;;  %v417_v29 = vld [vmem:[%s1540_s0] sm:$0x2]  ;;  %v420_v36 = vunpack.c.l.bf16 %v418_v34 }
 0x553   :  { %v364_v42 = vsel %vm361_vm7, %v363_v40, %v359_v39  ;;  %v1137_v44 = vpop.eup %1136  ;;  %v419_v30 = vunpack.c.l.bf16 %v417_v29 }
 0x554   :  { %v337_v45 = vmul.f32 %v1137_v44, %v334_v35  ;;  %vm342_vm8 = vweird.f32 %v1137_v44  ;;  %v387_v3 = vsub.f32 1.0, %v364_v42  ;;  %v403_v11 = vmul.f32 %v399_v4, %v364_v42 }
 0x555   :  { %vm343_vm11 = vmor %vm341_vm9, %vm342_vm8 }
 0x556   :  { %v338_v46 = vsub.f32 1.0, %v337_v45 }
 0x558   :  { %v339_v47 = vmul.f32 %v1137_v44, %v338_v46 }
 0x55a   :  { %v340_v48 = vadd.f32 %v1137_v44, %v339_v47 }
 0x55c   :  { %v344_v51 = vsel %vm343_vm11, %v1137_v44, %v340_v48 }
 0x55d   :  { %v349_v54 = vsel %vm346_vm12, %v348_v52, %v344_v51 }
 0x55e   :  { %v386_v63 = vsub.f32 1.0, %v349_v54  ;;  %v402_v9 = vmul.f32 %v398_v0, %v349_v54 }
 0x590   :  { %v369_v41 = vpop.permute.xlu2 %368 }
 0x591   :  { %v373_v43 = vmul.f32 %v369_v41, %v364_v42 }
 0x593   :  { %378 = vrot.lane.b32.xlu1 %v373_v43, %s1204_s17 }
 0x5a8   :  { %v367_v53 = vpop.permute.xlu1 %366 }
 0x5a9   :  { %v372_v55 = vmul.f32 %v367_v53, %v349_v54 }
 0x5ab   :  { %376 = vrot.lane.b32.xlu0 %v372_v55, %s1204_s17 }
 0x605   :  { %v379_v56 = vpop.permute.xlu1 %378 }
 0x606   :  { %v383_v57 = vadd.f32 %v379_v56, %v293_v21 }
 0x608   :  { %1138 = vtanh.f32 %v383_v57 }
 0x60e   :  { %v1139_v59 = vpop.eup %1138 }
 0x60f   :  { %392 = vrot.lane.b32.xlu0 %v1139_v59, %s1206_s23 }
 0x61d   :  { %v377_v60 = vpop.permute.xlu0 %376 }
 0x61e   :  { %v382_v61 = vadd.f32 %v377_v60, %v292_v27 }
 0x620   :  { %1140 = vtanh.f32 %v382_v61 }
 0x626   :  { %v1141_v62 = vpop.eup %1140 }
 0x627   :  { %390 = vrot.lane.b32.xlu2 %v1141_v62, %s1206_s23 }
 0x681   :  { %v391_v7 = vpop.permute.xlu2 %390  ;;  %v393_v8 = vpop.permute.xlu0 %392 }
 0x682   :  { %v396_v10 = vmul.f32 %v391_v7, %v386_v63  ;;  %v397_v12 = vmul.f32 %v393_v8, %v387_v3 }
 0x684   :  { %v1310_v13 = vadd.f32 %v402_v9, %v396_v10  ;;  %v1312_v14 = vadd.f32 %v403_v11, %v397_v12 }
 0x686   :  { %v421_v15 = vpack.c.bf16 %v1310_v13, %v1310_v13  ;;  %v422_v16 = vpack.c.bf16 %v1312_v14, %v1312_v14 }
 0x688   :  { %v425_v17 = vunpack.c.l.b16 %v421_v15  ;;  %v426_v18 = vunpack.c.l.b16 %v422_v16  ;;  %v527_v15 = vrot.slane %v1312_v14, 7 }
 0x68a   :  { %v427_v19 = vrot.slane %v425_v17, 2  ;;  %v428_v20 = vrot.slane %v426_v18, 1  ;;  %v526_v17 = vrot.slane %v1310_v13, 7 }
 0x68c   :  { %v429_v21 = vsel %vm174_vm10, %v428_v20, %v427_v19 }
 0x68d   :  { %v430_v22 = vpack.c.b16 %v429_v21, %v429_v21 }
 0x68f   :  { %431 = vrot.lane.b32.xlu1 %v430_v22, %s1206_s23 }
 0x701   :  { %v432_v23 = vpop.permute.xlu1 %431 }
 0x702   :  { %1084 = vmatmul.msk.bf16.vlgmr.msra.gmra.mxu3 %vm47_vm1, %v432_v23 }
 0x785   :  { %v445_v24 = vpop.f32.mrf.mxu3 }
 0x786   :  { %v446_v25 = vadd.f32 %v1241_v5, %v445_v24 }
 0x788   :  { %v450_v26 = vrot.slane %v446_v25, 5  ;;  %v451_v27 = vrot.slane %v446_v25, 6 }
 0x78a   :  { %496 = vrot.lane.b32.xlu0 %v451_v27, %s1204_s17  ;;  %494 = vrot.lane.b32.xlu2 %v450_v26, %s1204_s17  ;;  %v454_v31 = vadd.f32 %v450_v26, %v419_v30  ;;  %v455_v37 = vadd.f32 %v451_v27, %v420_v36 }
 0x78c   :  { %v1085_v32 = vmul.f32 -1.442695, %v454_v31  ;;  %v1086_v39 = vmul.f32 -1.442695, %v455_v37 }
 0x78d   :  { %v447_v28 = vpop.f32.mrf.mxu3 }
 0x78e   :  { %1142 = vpow2.f32 %v1085_v32 }
 0x794   :  { %v1143_v33 = vpop.eup %1142 }
 0x795   :  { %v462_v35 = vadd.f32 1.0, %v1143_v33 }
 0x797   :  { %1144 = vrcp.f32 %v462_v35  ;;  %v475_v46 = vand.u32 2147483648, %v462_v35  ;;  %vm469_vm14 = vweird.f32 %v462_v35  ;;  %v473_v47 = vand.u32 2147483647, %v462_v35 }
 0x798   :  { %1146 = vpow2.f32 %v1086_v39 }
 0x799   :  { %v476_v49 = vor.u32 1.1754944e-38, %v475_v46  ;;  %vm474_vm0 = vcmp.eq.f32.partialorder %v473_v47, 8.507059e+37 }
 0x79d   :  { %v1145_v38 = vpop.eup %1144 }
 0x79e   :  { %v465_v40 = vmul.f32 %v1145_v38, %v462_v35  ;;  %v1147_v42 = vpop.eup %1146  ;;  %vm470_vm13 = vweird.f32 %v1145_v38 }
 0x79f   :  { %v463_v44 = vadd.f32 1.0, %v1147_v42  ;;  %vm471_vm15 = vmor %vm469_vm14, %vm470_vm13 }
 0x7a0   :  { %v466_v41 = vsub.f32 1.0, %v465_v40  ;;  %v545_v40 = vld [vmem:[%s1540_s0] sm:$0x4] }
 0x7a1   :  { %1148 = vrcp.f32 %v463_v44  ;;  %v490_v59 = vand.u32 2147483648, %v463_v44  ;;  %vm484_vm3 = vweird.f32 %v463_v44  ;;  %v488_v60 = vand.u32 2147483647, %v463_v44 }
 0x7a2   :  { %v467_v43 = vmul.f32 %v1145_v38, %v466_v41  ;;  %v546_v41 = vld [vmem:[%s1540_s0 + $0x4] sm:$0x4]  ;;  %v547_v42 = vunpack.c.l.bf16 %v545_v40 }
 0x7a3   :  { %v491_v62 = vor.u32 1.1754944e-38, %v490_v59  ;;  %vm489_vm5 = vcmp.eq.f32.partialorder %v488_v60, 8.507059e+37 }
 0x7a4   :  { %v468_v45 = vadd.f32 %v1145_v38, %v467_v43  ;;  %v548_v43 = vunpack.c.l.bf16 %v546_v41 }
 0x7a6   :  { %v472_v48 = vsel %vm471_vm15, %v1145_v38, %v468_v45 }
 0x7a7   :  { %v477_v51 = vsel %vm474_vm0, %v476_v49, %v472_v48  ;;  %v1149_v53 = vpop.eup %1148 }
 0x7a8   :  { %v480_v54 = vmul.f32 %v1149_v53, %v463_v44  ;;  %vm485_vm2 = vweird.f32 %v1149_v53  ;;  %v514_v16 = vsub.f32 1.0, %v477_v51  ;;  %v530_v22 = vmul.f32 %v526_v17, %v477_v51 }
 0x7a9   :  { %vm486_vm4 = vmor %vm484_vm3, %vm485_vm2 }
 0x7aa   :  { %v481_v55 = vsub.f32 1.0, %v480_v54 }
 0x7ac   :  { %v482_v56 = vmul.f32 %v1149_v53, %v481_v55 }
 0x7ae   :  { %v483_v57 = vadd.f32 %v1149_v53, %v482_v56 }
 0x7b0   :  { %v487_v61 = vsel %vm486_vm4, %v1149_v53, %v483_v57 }
 0x7b1   :  { %v492_v0 = vsel %vm489_vm5, %v491_v62, %v487_v61 }
 0x7b2   :  { %v515_v12 = vsub.f32 1.0, %v492_v0  ;;  %v531_v20 = vmul.f32 %v527_v15, %v492_v0 }
 0x7e4   :  { %v495_v50 = vpop.permute.xlu2 %494 }
 0x7e5   :  { %v500_v52 = vmul.f32 %v495_v50, %v477_v51 }
 0x7e7   :  { %504 = vrot.lane.b32.xlu1 %v500_v52, %s1204_s17 }
 0x7fc   :  { %v497_v63 = vpop.permute.xlu0 %496 }
 0x7fd   :  { %v501_v3 = vmul.f32 %v497_v63, %v492_v0 }
 0x7ff   :  { %506 = vrot.lane.b32.xlu2 %v501_v3, %s1204_s17 }
 0x859   :  { %v507_v4 = vpop.permute.xlu2 %506  ;;  %v505_v7 = vpop.permute.xlu1 %504 }
 0x85a   :  { %v511_v8 = vadd.f32 %v507_v4, %v420_v36  ;;  %v510_v9 = vadd.f32 %v505_v7, %v419_v30 }
 0x85c   :  { %1150 = vtanh.f32 %v511_v8 }
 0x85d   :  { %1152 = vtanh.f32 %v510_v9 }
 0x862   :  { %v1151_v10 = vpop.eup %1150 }
 0x863   :  { %v1153_v11 = vpop.eup %1152  ;;  %520 = vrot.lane.b32.xlu1 %v1151_v10, %s1206_s23 }
 0x864   :  { %518 = vrot.lane.b32.xlu0 %v1153_v11, %s1206_s23 }
 0x8d5   :  { %v521_v18 = vpop.permute.xlu1 %520 }
 0x8d6   :  { %v519_v19 = vpop.permute.xlu0 %518  ;;  %v525_v21 = vmul.f32 %v521_v18, %v515_v12 }
 0x8d7   :  { %v524_v23 = vmul.f32 %v519_v19, %v514_v16 }
 0x8d8   :  { %v1336_v24 = vadd.f32 %v531_v20, %v525_v21 }
 0x8d9   :  { %v1338_v25 = vadd.f32 %v530_v22, %v524_v23 }
 0x8da   :  { %v550_v26 = vpack.c.bf16 %v1336_v24, %v1336_v24 }
 0x8db   :  { %v549_v27 = vpack.c.bf16 %v1338_v25, %v1338_v25 }
 0x8dc   :  { %v554_v28 = vunpack.c.l.b16 %v550_v26 }
 0x8dd   :  { %v553_v29 = vunpack.c.l.b16 %v549_v27 }
 0x8de   :  { %v556_v30 = vrot.slane %v554_v28, 2  ;;  %v654_v28 = vrot.slane %v1338_v25, 7 }
 0x8df   :  { %v555_v31 = vrot.slane %v553_v29, 3 }
 0x8e1   :  { %v557_v32 = vsel %vm174_vm10, %v556_v30, %v555_v31  ;;  %v655_v30 = vrot.slane %v1336_v24, 7 }
 0x8e2   :  { %v558_v33 = vpack.c.b16 %v557_v32, %v557_v32 }
 0x8e4   :  { %559 = vrot.lane.b32.xlu2 %v558_v33, %s1206_s23 }
 0x93e   :  { %v560_v34 = vpop.permute.xlu2 %559 }
 0x93f   :  { %1087 = vmatmul.msk.bf16.vlgmr.msrb.gmra.mxu0 %vm47_vm1, %v560_v34 }
 0x9bc   :  { %v573_v35 = vpop.f32.mrf.mxu0 }
 0x9bd   :  { %v574_v36 = vadd.f32 %v1241_v5, %v573_v35 }
 0x9bf   :  { %v578_v37 = vrot.slane %v574_v36, 4  ;;  %v579_v38 = vrot.slane %v574_v36, 5 }
 0x9c1   :  { %624 = vrot.lane.b32.xlu1 %v579_v38, %s1204_s17  ;;  %622 = vrot.lane.b32.xlu0 %v578_v37, %s1204_s17  ;;  %v582_v44 = vadd.f32 %v578_v37, %v547_v42  ;;  %v583_v45 = vadd.f32 %v579_v38, %v548_v43 }
 0x9c3   :  { %v1088_v46 = vmul.f32 -1.442695, %v582_v44  ;;  %v1089_v47 = vmul.f32 -1.442695, %v583_v45 }
 0x9c4   :  { %v575_v39 = vpop.f32.mrf.mxu0 }
 0x9c5   :  { %1154 = vpow2.f32 %v1088_v46 }
 0x9c6   :  { %1156 = vpow2.f32 %v1089_v47 }
 0x9cb   :  { %v1155_v48 = vpop.eup %1154 }
 0x9cc   :  { %v1157_v49 = vpop.eup %1156  ;;  %v590_v50 = vadd.f32 1.0, %v1155_v48 }
 0x9cd   :  { %v591_v51 = vadd.f32 1.0, %v1157_v49 }
 0x9ce   :  { %1158 = vrcp.f32 %v590_v50  ;;  %vm597_vm8 = vweird.f32 %v590_v50  ;;  %v603_v0 = vand.u32 2147483648, %v590_v50  ;;  %v601_v4 = vand.u32 2147483647, %v590_v50 }
 0x9cf   :  { %1160 = vrcp.f32 %v591_v51  ;;  %v618_v63 = vand.u32 2147483648, %v591_v51  ;;  %vm612_vm9 = vweird.f32 %v591_v51  ;;  %v616_v3 = vand.u32 2147483647, %v591_v51 }
 0x9d0   :  { %v604_v10 = vor.u32 1.1754944e-38, %v603_v0  ;;  %vm602_vm14 = vcmp.eq.f32.partialorder %v601_v4, 8.507059e+37 }
 0x9d1   :  { %v619_v9 = vor.u32 1.1754944e-38, %v618_v63  ;;  %vm617_vm13 = vcmp.eq.f32.partialorder %v616_v3, 8.507059e+37 }
 0x9d4   :  { %v1159_v52 = vpop.eup %1158 }
 0x9d5   :  { %v1161_v53 = vpop.eup %1160  ;;  %v593_v55 = vmul.f32 %v1159_v52, %v590_v50  ;;  %vm598_vm6 = vweird.f32 %v1159_v52 }
 0x9d6   :  { %v608_v54 = vmul.f32 %v1161_v53, %v591_v51  ;;  %vm613_vm7 = vweird.f32 %v1161_v53  ;;  %vm599_vm11 = vmor %vm597_vm8, %vm598_vm6 }
 0x9d7   :  { %v594_v57 = vsub.f32 1.0, %v593_v55  ;;  %vm614_vm12 = vmor %vm612_vm9, %vm613_vm7 }
 0x9d8   :  { %v609_v56 = vsub.f32 1.0, %v608_v54 }
 0x9d9   :  { %v595_v60 = vmul.f32 %v1159_v52, %v594_v57 }
 0x9da   :  { %v610_v59 = vmul.f32 %v1161_v53, %v609_v56 }
 0x9db   :  { %v596_v62 = vadd.f32 %v1159_v52, %v595_v60 }
 0x9dc   :  { %v611_v61 = vadd.f32 %v1161_v53, %v610_v59 }
 0x9dd   :  { %v600_v8 = vsel %vm599_vm11, %v1159_v52, %v596_v62 }
 0x9de   :  { %v615_v7 = vsel %vm614_vm12, %v1161_v53, %v611_v61  ;;  %v605_v16 = vsel %vm602_vm14, %v604_v10, %v600_v8  ;;  %v674_v53 = vld [vmem:[%s1540_s0 + $0x4] sm:$0x4] }
 0x9df   :  { %v620_v12 = vsel %vm617_vm13, %v619_v9, %v615_v7  ;;  %v642_v27 = vsub.f32 1.0, %v605_v16  ;;  %v658_v33 = vmul.f32 %v654_v28, %v605_v16  ;;  %v676_v54 = vunpack.c.l.bf16 %v674_v53 }
 0x9e0   :  { %v643_v29 = vsub.f32 1.0, %v620_v12  ;;  %v659_v35 = vmul.f32 %v655_v30, %v620_v12 }
 0xa33   :  { %v625_v11 = vpop.permute.xlu1 %624  ;;  %v623_v15 = vpop.permute.xlu0 %622 }
 0xa34   :  { %v629_v17 = vmul.f32 %v625_v11, %v620_v12  ;;  %v628_v18 = vmul.f32 %v623_v15, %v605_v16 }
 0xa36   :  { %634 = vrot.lane.b32.xlu0 %v629_v17, %s1204_s17  ;;  %632 = vrot.lane.b32.xlu2 %v628_v18, %s1204_s17 }
 0xa90   :  { %v633_v19 = vpop.permute.xlu2 %632 }
 0xa91   :  { %v638_v20 = vadd.f32 %v633_v19, %v547_v42 }
 0xa93   :  { %1162 = vtanh.f32 %v638_v20 }
 0xa99   :  { %v1163_v21 = vpop.eup %1162 }
 0xa9a   :  { %646 = vrot.lane.b32.xlu1 %v1163_v21, %s1206_s23 }
 0xaa8   :  { %v635_v22 = vpop.permute.xlu0 %634 }
 0xaa9   :  { %v639_v23 = vadd.f32 %v635_v22, %v548_v43 }
 0xaab   :  { %1164 = vtanh.f32 %v639_v23 }
 0xab1   :  { %v1165_v26 = vpop.eup %1164 }
 0xab2   :  { %648 = vrot.lane.b32.xlu2 %v1165_v26, %s1206_s23 }
 0xb0c   :  { %v647_v31 = vpop.permute.xlu1 %646  ;;  %v649_v32 = vpop.permute.xlu2 %648 }
 0xb0d   :  { %v652_v34 = vmul.f32 %v647_v31, %v642_v27  ;;  %v653_v36 = vmul.f32 %v649_v32, %v643_v29 }
 0xb0f   :  { %v1362_v37 = vadd.f32 %v658_v33, %v652_v34  ;;  %v1364_v38 = vadd.f32 %v659_v35, %v653_v36 }
 0xb11   :  { %v677_v39 = vpack.c.bf16 %v1362_v37, %v1362_v37  ;;  %v678_v40 = vpack.c.bf16 %v1364_v38, %v1364_v38 }
 0xb13   :  { %v681_v41 = vunpack.c.l.b16 %v677_v39  ;;  %v682_v42 = vunpack.c.l.b16 %v678_v40 }
 0xb15   :  { %v683_v43 = vrot.slane %v681_v41, 4  ;;  %v684_v44 = vrot.slane %v682_v42, 3  ;;  %v782_v42 = vrot.slane %v1362_v37, 7 }
 0xb17   :  { %v685_v45 = vsel %vm174_vm10, %v684_v44, %v683_v43  ;;  %v783_v44 = vrot.slane %v1364_v38, 7 }
 0xb18   :  { %v686_v46 = vpack.c.b16 %v685_v45, %v685_v45 }
 0xb1a   :  { %687 = vrot.lane.b32.xlu0 %v686_v46, %s1206_s23 }
 0xb8c   :  { %v688_v47 = vpop.permute.xlu0 %687 }
 0xb8d   :  { %1090 = vmatmul.msk.bf16.vlgmr.msrb.gmra.mxu1 %vm47_vm1, %v688_v47 }
 0xc0a   :  { %v701_v48 = vpop.f32.mrf.mxu1 }
 0xc0b   :  { %v702_v49 = vadd.f32 %v1241_v5, %v701_v48  ;;  %v673_v5 = vld [vmem:[%s1540_s0] sm:$0x4] }
 0xc0c   :  { %v675_v60 = vunpack.c.l.bf16 %v673_v5 }
 0xc0d   :  { %v706_v50 = vrot.slane %v702_v49, 3  ;;  %v707_v51 = vrot.slane %v702_v49, 4 }
 0xc0f   :  { %752 = vrot.lane.b32.xlu2 %v707_v51, %s1204_s17  ;;  %750 = vrot.lane.b32.xlu1 %v706_v50, %s1204_s17  ;;  %v711_v55 = vadd.f32 %v707_v51, %v676_v54  ;;  %v710_v61 = vadd.f32 %v706_v50, %v675_v60 }
 0xc11   :  { %v1092_v56 = vmul.f32 -1.442695, %v711_v55  ;;  %v1091_v63 = vmul.f32 -1.442695, %v710_v61 }
 0xc12   :  { %v703_v52 = vpop.f32.mrf.mxu1 }
 0xc13   :  { %1166 = vpow2.f32 %v1092_v56 }
 0xc19   :  { %v1167_v57 = vpop.eup %1166 }
 0xc1a   :  { %v719_v59 = vadd.f32 1.0, %v1167_v57 }
 0xc1c   :  { %1168 = vrcp.f32 %v719_v59  ;;  %v746_v10 = vand.u32 2147483648, %v719_v59  ;;  %vm740_vm0 = vweird.f32 %v719_v59  ;;  %v744_v11 = vand.u32 2147483647, %v719_v59 }
 0xc1d   :  { %1170 = vpow2.f32 %v1091_v63  ;;  %v1402_v63 = vld [vmem:[%s1539_s2] ss:$0 sm:$0xff] }
 0xc1e   :  { %v747_v15 = vor.u32 1.1754944e-38, %v746_v10  ;;  %vm745_vm3 = vcmp.eq.f32.partialorder %v744_v11, 8.507059e+37 }
 0xc22   :  { %v1169_v62 = vpop.eup %1168 }
 0xc23   :  { %v736_v0 = vmul.f32 %v1169_v62, %v719_v59  ;;  %v1171_v4 = vpop.eup %1170  ;;  %vm741_vm15 = vweird.f32 %v1169_v62 }
 0xc24   :  { %v718_v8 = vadd.f32 1.0, %v1171_v4  ;;  %vm742_vm2 = vmor %vm740_vm0, %vm741_vm15 }
 0xc25   :  { %v737_v3 = vsub.f32 1.0, %v736_v0 }
 0xc26   :  { %1172 = vrcp.f32 %v718_v8  ;;  %v731_v26 = vand.u32 2147483648, %v718_v8  ;;  %vm725_vm5 = vweird.f32 %v718_v8  ;;  %v729_v27 = vand.u32 2147483647, %v718_v8 }
 0xc27   :  { %v738_v7 = vmul.f32 %v1169_v62, %v737_v3 }
 0xc28   :  { %v732_v29 = vor.u32 1.1754944e-38, %v731_v26  ;;  %vm730_vm7 = vcmp.eq.f32.partialorder %v729_v27, 8.507059e+37 }
 0xc29   :  { %v739_v9 = vadd.f32 %v1169_v62, %v738_v7 }
 0xc2b   :  { %v743_v12 = vsel %vm742_vm2, %v1169_v62, %v739_v9 }
 0xc2c   :  { %v748_v17 = vsel %vm745_vm3, %v747_v15, %v743_v12  ;;  %v1173_v19 = vpop.eup %1172  ;;  %v802_v15 = vld [vmem:[%s1540_s0 + $0x4] sm:$0x8] }
 0xc2d   :  { %v721_v20 = vmul.f32 %v1173_v19, %v718_v8  ;;  %vm726_vm4 = vweird.f32 %v1173_v19  ;;  %v771_v43 = vsub.f32 1.0, %v748_v17  ;;  %v787_v49 = vmul.f32 %v783_v44, %v748_v17  ;;  %v801_v8 = vld [vmem:[%s1540_s0] sm:$0x8] }
 0xc2e   :  { %vm727_vm6 = vmor %vm725_vm5, %vm726_vm4  ;;  %v803_v9 = vunpack.c.l.bf16 %v801_v8 }
 0xc2f   :  { %v722_v21 = vsub.f32 1.0, %v721_v20 }
 0xc31   :  { %v723_v22 = vmul.f32 %v1173_v19, %v722_v21 }
 0xc33   :  { %v724_v23 = vadd.f32 %v1173_v19, %v723_v22 }
 0xc35   :  { %v728_v28 = vsel %vm727_vm6, %v1173_v19, %v724_v23 }
 0xc36   :  { %v733_v31 = vsel %vm730_vm7, %v732_v29, %v728_v28 }
 0xc37   :  { %v770_v41 = vsub.f32 1.0, %v733_v31  ;;  %v786_v47 = vmul.f32 %v782_v42, %v733_v31 }
 0xc69   :  { %v753_v16 = vpop.permute.xlu2 %752 }
 0xc6a   :  { %v757_v18 = vmul.f32 %v753_v16, %v748_v17  ;;  %v804_v17 = vunpack.c.l.bf16 %v802_v15 }
 0xc6c   :  { %762 = vrot.lane.b32.xlu1 %v757_v18, %s1204_s17 }
 0xc81   :  { %v751_v30 = vpop.permute.xlu1 %750 }
 0xc82   :  { %v756_v32 = vmul.f32 %v751_v30, %v733_v31 }
 0xc84   :  { %760 = vrot.lane.b32.xlu0 %v756_v32, %s1204_s17 }
 0xcde   :  { %v763_v33 = vpop.permute.xlu1 %762 }
 0xcdf   :  { %v767_v34 = vadd.f32 %v763_v33, %v676_v54 }
 0xce1   :  { %1174 = vtanh.f32 %v767_v34 }
 0xce7   :  { %v1175_v35 = vpop.eup %1174 }
 0xce8   :  { %776 = vrot.lane.b32.xlu0 %v1175_v35, %s1206_s23 }
 0xcf6   :  { %v761_v36 = vpop.permute.xlu0 %760 }
 0xcf7   :  { %v766_v39 = vadd.f32 %v761_v36, %v675_v60 }
 0xcf9   :  { %1176 = vtanh.f32 %v766_v39 }
 0xcff   :  { %v1177_v40 = vpop.eup %1176 }
 0xd00   :  { %774 = vrot.lane.b32.xlu2 %v1177_v40, %s1206_s23 }
 0xd5a   :  { %v775_v45 = vpop.permute.xlu2 %774  ;;  %v777_v46 = vpop.permute.xlu0 %776 }
 0xd5b   :  { %v780_v48 = vmul.f32 %v775_v45, %v770_v41  ;;  %v781_v50 = vmul.f32 %v777_v46, %v771_v43 }
 0xd5d   :  { %v1388_v51 = vadd.f32 %v786_v47, %v780_v48  ;;  %v1390_v52 = vadd.f32 %v787_v49, %v781_v50 }
 0xd5f   :  { %v805_v53 = vpack.c.bf16 %v1388_v51, %v1388_v51  ;;  %v806_v54 = vpack.c.bf16 %v1390_v52, %v1390_v52 }
 0xd61   :  { %v809_v55 = vunpack.c.l.b16 %v805_v53  ;;  %v810_v56 = vunpack.c.l.b16 %v806_v54 }
 0xd63   :  { %v811_v57 = vrot.slane %v809_v55, 5  ;;  %v812_v5 = vrot.slane %v810_v56, 4 }
 0xd65   :  { %v813_v59 = vsel %vm174_vm10, %v812_v5, %v811_v57 }
 0xd66   :  { %v814_v60 = vpack.c.b16 %v813_v59, %v813_v59  ;;  %v911_v59 = vrot.slane %v1390_v52, 7 }
 0xd68   :  { %815 = vrot.lane.b32.xlu1 %v814_v60, %s1206_s23 }
 0xdda   :  { %v816_v61 = vpop.permute.xlu1 %815 }
 0xddb   :  { %1093 = vmatmul.msk.bf16.vlgmr.msrb.gmra.mxu2 %vm47_vm1, %v816_v61  ;;  %v910_v61 = vrot.slane %v1388_v51, 7 }
 0xe5e   :  { %v829_v62 = vpop.f32.mrf.mxu2 }
 0xe5f   :  { %v830_v0 = vadd.f32 %v1402_v63, %v829_v62 }
 0xe61   :  { %v834_v3 = vrot.slane %v830_v0, 2  ;;  %v835_v4 = vrot.slane %v830_v0, 3 }
 0xe63   :  { %880 = vrot.lane.b32.xlu0 %v835_v4, %s1204_s17  ;;  %878 = vrot.lane.b32.xlu2 %v834_v3, %s1204_s17  ;;  %v838_v10 = vadd.f32 %v834_v3, %v803_v9  ;;  %v839_v18 = vadd.f32 %v835_v4, %v804_v17 }
 0xe65   :  { %v1094_v11 = vmul.f32 -1.442695, %v838_v10  ;;  %v1095_v20 = vmul.f32 -1.442695, %v839_v18 }
 0xe66   :  { %v831_v7 = vpop.f32.mrf.mxu2 }
 0xe67   :  { %1178 = vpow2.f32 %v1094_v11 }
 0xe6d   :  { %v1179_v12 = vpop.eup %1178 }
 0xe6e   :  { %v846_v16 = vadd.f32 1.0, %v1179_v12 }
 0xe70   :  { %1180 = vrcp.f32 %v846_v16  ;;  %v859_v29 = vand.u32 2147483648, %v846_v16  ;;  %vm853_vm9 = vweird.f32 %v846_v16  ;;  %v857_v30 = vand.u32 2147483647, %v846_v16 }
 0xe71   :  { %1182 = vpow2.f32 %v1095_v20 }
 0xe72   :  { %v860_v32 = vor.u32 1.1754944e-38, %v859_v29  ;;  %vm858_vm12 = vcmp.eq.f32.partialorder %v857_v30, 8.507059e+37  ;;  %v1436_v29 = vld [vmem:[%s1540_s0] sm:$0x8]  ;;  %v930_v30 = vld [vmem:[%s1540_s0 + $0x4] sm:$0x8] }
 0xe76   :  { %v1181_v19 = vpop.eup %1180 }
 0xe77   :  { %v849_v21 = vmul.f32 %v1181_v19, %v846_v16  ;;  %v1183_v23 = vpop.eup %1182  ;;  %vm854_vm8 = vweird.f32 %v1181_v19 }
 0xe78   :  { %v847_v27 = vadd.f32 1.0, %v1183_v23  ;;  %vm855_vm11 = vmor %vm853_vm9, %vm854_vm8  ;;  %vm160_vm8 = vcmask 253952   ;;  %vm287_vm9 = vcmask 254977  }
 0xe79   :  { %v850_v22 = vsub.f32 1.0, %v849_v21 }
 0xe7a   :  { %1184 = vrcp.f32 %v847_v27  ;;  %v874_v43 = vand.u32 2147483648, %v847_v27  ;;  %vm868_vm14 = vweird.f32 %v847_v27  ;;  %v872_v44 = vand.u32 2147483647, %v847_v27 }
 0xe7b   :  { %v851_v26 = vmul.f32 %v1181_v19, %v850_v22 }
 0xe7c   :  { %v875_v46 = vor.u32 1.1754944e-38, %v874_v43  ;;  %vm873_vm0 = vcmp.eq.f32.partialorder %v872_v44, 8.507059e+37 }
 0xe7d   :  { %v852_v28 = vadd.f32 %v1181_v19, %v851_v26 }
 0xe7f   :  { %v856_v31 = vsel %vm855_vm11, %v1181_v19, %v852_v28  ;;  %vm542_vm11 = vcmask 257027  }
 0xe80   :  { %v861_v34 = vsel %vm858_vm12, %v860_v32, %v856_v31  ;;  %v1185_v36 = vpop.eup %1184  ;;  %v931_v31 = vunpack.c.l.bf16 %v1436_v29  ;;  %v932_v32 = vunpack.c.l.bf16 %v930_v30  ;;  %vm670_vm12 = vcmask 258052  }
 0xe81   :  { %v864_v39 = vmul.f32 %v1185_v36, %v847_v27  ;;  %vm869_vm13 = vweird.f32 %v1185_v36  ;;  %v898_v60 = vsub.f32 1.0, %v861_v34  ;;  %v914_v7 = vmul.f32 %v910_v61, %v861_v34 }
 0xe82   :  { %vm870_vm15 = vmor %vm868_vm14, %vm869_vm13  ;;  %vm926_vm13 = vcmask 260102   ;;  %vm414_vm14 = vcmask 256002  }
 0xe83   :  { %v865_v40 = vsub.f32 1.0, %v864_v39 }
 0xe85   :  { %v866_v41 = vmul.f32 %v1185_v36, %v865_v40 }
 0xe87   :  { %v867_v42 = vadd.f32 %v1185_v36, %v866_v41 }
 0xe89   :  { %v871_v45 = vsel %vm870_vm15, %v1185_v36, %v867_v42  ;;  %vm798_vm15 = vcmask 259077  }
 0xe8a   :  { %v876_v48 = vsel %vm873_vm0, %v875_v46, %v871_v45  ;;  %vm1054_vm0 = vcmask 261127  }
 0xe8b   :  { %v899_v5 = vsub.f32 1.0, %v876_v48  ;;  %v915_v3 = vmul.f32 %v911_v59, %v876_v48 }
 0xebd   :  { %v879_v33 = vpop.permute.xlu2 %878 }
 0xebe   :  { %v884_v35 = vmul.f32 %v879_v33, %v861_v34 }
 0xec0   :  { %888 = vrot.lane.b32.xlu1 %v884_v35, %s1204_s17 }
 0xed5   :  { %v881_v47 = vpop.permute.xlu0 %880 }
 0xed6   :  { %v885_v49 = vmul.f32 %v881_v47, %v876_v48 }
 0xed8   :  { %890 = vrot.lane.b32.xlu2 %v885_v49, %s1204_s17 }
 0xf32   :  { %v891_v50 = vpop.permute.xlu2 %890  ;;  %v889_v53 = vpop.permute.xlu1 %888 }
 0xf33   :  { %v895_v54 = vadd.f32 %v891_v50, %v804_v17  ;;  %v894_v55 = vadd.f32 %v889_v53, %v803_v9 }
 0xf35   :  { %1186 = vtanh.f32 %v895_v54 }
 0xf36   :  { %1188 = vtanh.f32 %v894_v55 }
 0xf3b   :  { %v1187_v56 = vpop.eup %1186 }
 0xf3c   :  { %v1189_v57 = vpop.eup %1188  ;;  %904 = vrot.lane.b32.xlu1 %v1187_v56, %s1206_s23 }
 0xf3d   :  { %902 = vrot.lane.b32.xlu0 %v1189_v57, %s1206_s23 }
 0xfae   :  { %v905_v62 = vpop.permute.xlu1 %904 }
 0xfaf   :  { %v903_v0 = vpop.permute.xlu0 %902  ;;  %v909_v4 = vmul.f32 %v905_v62, %v899_v5 }
 0xfb0   :  { %v908_v8 = vmul.f32 %v903_v0, %v898_v60 }
 0xfb1   :  { %v1419_v9 = vadd.f32 %v915_v3, %v909_v4 }
 0xfb2   :  { %v1421_v10 = vadd.f32 %v914_v7, %v908_v8 }
 0xfb3   :  { %v934_v11 = vpack.c.bf16 %v1419_v9, %v1419_v9 }
 0xfb4   :  { %v933_v12 = vpack.c.bf16 %v1421_v10, %v1421_v10 }
 0xfb5   :  { %v938_v15 = vunpack.c.l.b16 %v934_v11 }
 0xfb6   :  { %v937_v16 = vunpack.c.l.b16 %v933_v12 }
 0xfb7   :  { %v940_v17 = vrot.slane %v938_v15, 5 }
 0xfb8   :  { %v939_v18 = vrot.slane %v937_v16, 6 }
 0xfba   :  { %v941_v19 = vsel %vm174_vm10, %v940_v17, %v939_v18  ;;  %v1038_v17 = vrot.slane %v1421_v10, 7 }
 0xfbb   :  { %v942_v20 = vpack.c.b16 %v941_v19, %v941_v19 }
 0xfbd   :  { %943 = vrot.lane.b32.xlu2 %v942_v20, %s1206_s23 }
0x1017   :  { %v944_v21 = vpop.permute.xlu2 %943 }
0x1018   :  { %1096 = vmatmul.msk.bf16.vlgmr.msrb.gmra.mxu3 %vm47_vm1, %v944_v21 }
0x109b   :  { %v957_v22 = vpop.f32.mrf.mxu3 }
0x109c   :  { %v958_v23 = vadd.f32 %v1402_v63, %v957_v22 }
0x109e   :  { %v962_v26 = vrot.slane %v958_v23, 1  ;;  %v963_v27 = vrot.slane %v958_v23, 2 }
0x10a0   :  { %1008 = vrot.lane.b32.xlu0 %v963_v27, %s1204_s17  ;;  %1006 = vrot.lane.b32.xlu1 %v962_v26, %s1204_s17  ;;  %v966_v63 = vadd.f32 %v962_v26, %v931_v31  ;;  %v967_v33 = vadd.f32 %v963_v27, %v932_v32 }
0x10a2   :  { %v1097_v34 = vmul.f32 -1.442695, %v966_v63  ;;  %v1098_v35 = vmul.f32 -1.442695, %v967_v33 }
0x10a3   :  { %v959_v28 = vpop.f32.mrf.mxu3 }
0x10a4   :  { %1190 = vpow2.f32 %v1097_v34 }
0x10a5   :  { %1192 = vpow2.f32 %v1098_v35 }
0x10aa   :  { %v1191_v36 = vpop.eup %1190 }
0x10ab   :  { %v1193_v39 = vpop.eup %1192  ;;  %v974_v40 = vadd.f32 1.0, %v1191_v36 }
0x10ac   :  { %v975_v41 = vadd.f32 1.0, %v1193_v39 }
0x10ad   :  { %1194 = vrcp.f32 %v974_v40  ;;  %vm981_vm2 = vweird.f32 %v974_v40  ;;  %v987_v55 = vand.u32 2147483648, %v974_v40  ;;  %v985_v57 = vand.u32 2147483647, %v974_v40 }
0x10ae   :  { %1196 = vrcp.f32 %v975_v41  ;;  %v1002_v54 = vand.u32 2147483648, %v975_v41  ;;  %vm996_vm3 = vweird.f32 %v975_v41  ;;  %v1000_v56 = vand.u32 2147483647, %v975_v41 }
0x10af   :  { %v988_v61 = vor.u32 1.1754944e-38, %v987_v55  ;;  %vm986_vm7 = vcmp.eq.f32.partialorder %v985_v57, 8.507059e+37 }
0x10b0   :  { %v1003_v60 = vor.u32 1.1754944e-38, %v1002_v54  ;;  %vm1001_vm6 = vcmp.eq.f32.partialorder %v1000_v56, 8.507059e+37 }
0x10b3   :  { %v1195_v42 = vpop.eup %1194 }
0x10b4   :  { %v1197_v43 = vpop.eup %1196  ;;  %v977_v45 = vmul.f32 %v1195_v42, %v974_v40  ;;  %vm982_vm1 = vweird.f32 %v1195_v42 }
0x10b5   :  { %v992_v44 = vmul.f32 %v1197_v43, %v975_v41  ;;  %vm997_vm10 = vweird.f32 %v1197_v43  ;;  %vm983_vm4 = vmor %vm981_vm2, %vm982_vm1 }
0x10b6   :  { %v978_v47 = vsub.f32 1.0, %v977_v45  ;;  %vm998_vm5 = vmor %vm996_vm3, %vm997_vm10 }
0x10b7   :  { %v993_v46 = vsub.f32 1.0, %v992_v44 }
0x10b8   :  { %v979_v49 = vmul.f32 %v1195_v42, %v978_v47 }
0x10b9   :  { %v994_v48 = vmul.f32 %v1197_v43, %v993_v46 }
0x10ba   :  { %v980_v53 = vadd.f32 %v1195_v42, %v979_v49 }
0x10bb   :  { %v995_v50 = vadd.f32 %v1197_v43, %v994_v48 }
0x10bc   :  { %v984_v59 = vsel %vm983_vm4, %v1195_v42, %v980_v53 }
0x10bd   :  { %v999_v5 = vsel %vm998_vm5, %v1197_v43, %v995_v50  ;;  %v989_v4 = vsel %vm986_vm7, %v988_v61, %v984_v59 }
0x10be   :  { %v1004_v0 = vsel %vm1001_vm6, %v1003_v60, %v999_v5  ;;  %v1026_v16 = vsub.f32 1.0, %v989_v4  ;;  %v1042_v21 = vmul.f32 %v1038_v17, %v989_v4 }
0x1112   :  { %v1009_v62 = vpop.permute.xlu0 %1008  ;;  %v1007_v3 = vpop.permute.xlu1 %1006 }
0x1113   :  { %v1013_v7 = vmul.f32 %v1009_v62, %v1004_v0  ;;  %v1012_v8 = vmul.f32 %v1007_v3, %v989_v4 }
0x1115   :  { %1018 = vrot.lane.b32.xlu2 %v1013_v7, %s1204_s17  ;;  %1016 = vrot.lane.b32.xlu0 %v1012_v8, %s1204_s17 }
0x111d   :  { %154 = vrot.lane.b32.xlu0 %v1262_v2, %s1206_s23 }
0x1125   :  { %283 = vrot.lane.b32.xlu0 %v1284_v1, %s1206_s23 }
0x112d   :  { %536 = vrot.lane.b32.xlu0 %v1338_v25, %s1206_s23 }
0x1135   :  { %666 = vrot.lane.b32.xlu0 %v1364_v38, %s1206_s23 }
0x113d   :  { %920 = vrot.lane.b32.xlu0 %v1421_v10, %s1206_s23 }
0x116f   :  { %v1019_v11 = vpop.permute.xlu2 %1018 }
0x1170   :  { %v1023_v12 = vadd.f32 %v1019_v11, %v932_v32 }
0x1172   :  { %1198 = vtanh.f32 %v1023_v12 }
0x1178   :  { %v1199_v15 = vpop.eup %1198 }
0x1179   :  { %1032 = vrot.lane.b32.xlu1 %v1199_v15, %s1206_s23 }
0x1181   :  { %156 = vrot.lane.b32.xlu1 %v1258_v58, %s1206_s23 }
0x1187   :  { %v1017_v2 = vpop.permute.xlu0 %1016 }
0x1188   :  { %v1022_v1 = vadd.f32 %v1017_v2, %v931_v31 }
0x1189   :  { %408 = vrot.lane.b32.xlu1 %v1310_v13, %s1206_s23 }
0x118a   :  { %1200 = vtanh.f32 %v1022_v1 }
0x118f   :  { %v155_v25 = vpop.permute.xlu0 %154 }
0x1190   :  { %v1201_v38 = vpop.eup %1200  ;;  %161 = vst.msk [vmem:[%s1541_s3] sm:$0x1] %vm160_vm8, %v155_v25 }
0x1191   :  { %538 = vrot.lane.b32.xlu1 %v1336_v24, %s1206_s23  ;;  %1030 = vrot.lane.b32.xlu2 %v1201_v38, %s1206_s23 }
0x1197   :  { %v284_v58 = vpop.permute.xlu0 %283 }
0x1198   :  { %289 = vst.msk [vmem:[%s1541_s3 + $0x8] sm:$0x2] %vm287_vm9, %v284_v58 }
0x1199   :  { %792 = vrot.lane.b32.xlu1 %v1388_v51, %s1206_s23  ;;  %281 = vrot.lane.b32.xlu2 %v1286_v6, %s1206_s23  ;;  %v1039_v51 = vrot.slane %v1419_v9, 7 }
0x119b   :  { %v1043_v20 = vmul.f32 %v1039_v51, %v1004_v0 }
0x119f   :  { %v537_v13 = vpop.permute.xlu0 %536 }
0x11a0   :  { %543 = vst.msk [vmem:[%s1541_s3] sm:$0x8] %vm542_vm11, %v537_v13 }
0x11a1   :  { %922 = vrot.lane.b32.xlu1 %v1419_v9, %s1206_s23  ;;  %410 = vrot.lane.b32.xlu2 %v1312_v14, %s1206_s23  ;;  %v1027_v14 = vsub.f32 1.0, %v1004_v0 }
0x11a7   :  { %v667_v24 = vpop.permute.xlu0 %666 }
0x11a8   :  { %672 = vst.msk [vmem:[%s1541_s3 + $0x8] sm:$0x10] %vm670_vm12, %v667_v24 }
0x11a9   :  { %664 = vrot.lane.b32.xlu2 %v1362_v37, %s1206_s23 }
0x11af   :  { %v921_v6 = vpop.permute.xlu0 %920 }
0x11b0   :  { %927 = vst.msk [vmem:[%s1541_s3] sm:$0x40] %vm926_vm13, %v921_v6 }
0x11b1   :  { %794 = vrot.lane.b32.xlu2 %v1390_v52, %s1206_s23 }
0x11eb   :  { %v1033_v18 = vpop.permute.xlu1 %1032  ;;  %v1031_v19 = vpop.permute.xlu2 %1030 }
0x11ec   :  { %v1037_v37 = vmul.f32 %v1033_v18, %v1027_v14  ;;  %v1036_v22 = vmul.f32 %v1031_v19, %v1026_v16 }
0x11ee   :  { %v1045_v23 = vadd.f32 %v1043_v20, %v1037_v37  ;;  %v1044_v26 = vadd.f32 %v1042_v21, %v1036_v22 }
0x11f0   :  { %1050 = vrot.lane.b32.xlu0 %v1045_v23, %s1206_s23  ;;  %1048 = vrot.lane.b32.xlu2 %v1044_v26, %s1206_s23  ;;  %v1057_v27 = vrot.slane %v1045_v23, 7 }
0x11f2   :  { %1058 = vrot.lane.b32.xlu1 %v1057_v27, %s1206_s23 }
0x11f3   :  { %v157_v52 = vpop.permute.xlu1 %156  ;;  %v282_v9 = vpop.permute.xlu2 %281 }
0x11f4   :  { %162 = vst.msk [vmem:[%s1541_s3 + $0x8] sm:$0x1] %vm160_vm8, %v157_v52 }
0x11f5   :  { %288 = vst.msk [vmem:[%s1541_s3] sm:$0x2] %vm287_vm9, %v282_v9 }
0x11fb   :  { %v409_v10 = vpop.permute.xlu1 %408  ;;  %v411_v28 = vpop.permute.xlu2 %410 }
0x11fc   :  { %415 = vst.msk [vmem:[%s1541_s3] sm:$0x4] %vm414_vm14, %v409_v10 }
0x11fd   :  { %416 = vst.msk [vmem:[%s1541_s3 + $0x8] sm:$0x4] %vm414_vm14, %v411_v28 }
0x1203   :  { %v539_v29 = vpop.permute.xlu1 %538  ;;  %v665_v30 = vpop.permute.xlu2 %664 }
0x1204   :  { %544 = vst.msk [vmem:[%s1541_s3 + $0x8] sm:$0x8] %vm542_vm11, %v539_v29 }
0x1205   :  { %671 = vst.msk [vmem:[%s1541_s3] sm:$0x10] %vm670_vm12, %v665_v30 }
0x120b   :  { %v793_v31 = vpop.permute.xlu1 %792  ;;  %v795_v32 = vpop.permute.xlu2 %794 }
0x120c   :  { %799 = vst.msk [vmem:[%s1541_s3] sm:$0x20] %vm798_vm15, %v793_v31 }
0x120d   :  { %800 = vst.msk [vmem:[%s1541_s3 + $0x8] sm:$0x20] %vm798_vm15, %v795_v32 }
0x1213   :  { %v923_v63 = vpop.permute.xlu1 %922 }
0x1214   :  { %928 = vst.msk [vmem:[%s1541_s3 + $0x8] sm:$0x40] %vm926_vm13, %v923_v63 }
0x124a   :  { %v1049_v33 = vpop.permute.xlu2 %1048 }
0x124b   :  { %1055 = vst.msk [vmem:[%s1541_s3] sm:$0x80] %vm1054_vm0, %v1049_v33 }
0x124c   :  { %1061 = vst.msk [vmem:[#allocation2 - $0x7] sm:$0x80] %vm1054_vm0, %v1049_v33 }
0x1262   :  { %v1051_v34 = vpop.permute.xlu0 %1050 }
0x1263   :  { %1056 = vst.msk [vmem:[%s1541_s3 + $0x8] sm:$0x80] %vm1054_vm0, %v1051_v34 }
0x1264   :  { %v1059_v35 = vpop.permute.xlu1 %1058 }
0x1265   :  { %1062 = vst.msk [vmem:[#allocation2 + $0x1] sm:$0x1] %vm160_vm8, %v1059_v35 }

</bundles_post_ra>
